<compile_context>
chip_gen: v5e
topology: v5e:2x2
jax: 0.10.0
libtpu: 0.0.40
codegen_flags: <defaults>
</compile_context>

<pallas_src>
import numpy as np
import jax
import jax.numpy as jnp
from jax.experimental import pallas as pl
from jax.experimental.pallas import tpu as pltpu

# ---- module configuration (toy sizes) ----
IN_CH, OUT_CH = 8, 16
GROUPS, EPS, OUT_SCALE = 4, 1e-6, 1.0
N, H, W = 2, 16, 16
HW = H * W
HO, WO = H // 2, W // 2


# --------------------- hoisted compile-time constants ------------------------
def _tap_masks():
    """(9, HW) validity masks for the 3x3 taps (zero padding at the border)."""
    ys, xs = np.divmod(np.arange(HW), W)
    masks = np.zeros((9, HW), np.float32)
    k = 0
    for dy in (-1, 0, 1):
        for dx in (-1, 0, 1):
            ok = (ys + dy >= 0) & (ys + dy < H) & (xs + dx >= 0) & (xs + dx < W)
            masks[k] = ok.astype(np.float32)
            k += 1
    return masks


def _even_pixel_selector():
    """(HW, HO*WO) 0/1 matrix picking full-res pixel (2*yo, 2*xo) per output."""
    sel = np.zeros((HW, HO * WO), np.float32)
    for m in range(HO * WO):
        yo, xo = divmod(m, WO)
        sel[(2 * yo) * W + 2 * xo, m] = 1.0
    return sel


def _group_matrix(c):
    """(C, C) GroupNorm membership matrix: 1 where channels share a group."""
    gsize = c // GROUPS
    idx = np.arange(c) // gsize
    return (idx[:, None] == idx[None, :]).astype(np.float32)


# --------------------------- fused block kernel ------------------------------
def _fused_down_encoder_kernel(x_ref,
                               gm1_ref, g1_ref, be1_ref, w1_ref, b1_ref,
                               gm2_ref, g2_ref, be2_ref, w2_ref, b2_ref,
                               ws_ref, bs_ref, wd_ref, bd_ref,
                               mask_ref, sel_ref,
                               o_ref):
    """One image per grid step; activations live as (C, HW) lane-dense tiles."""
    x2d = x_ref[0]                                              # (IN_CH, 256) f32

    def gn_silu(a, gm, gamma, beta, gsize):
        # GroupNorm over (channels-in-group x all pixels), then SiLU.  f32.
        denom = float(HW * gsize)
        gsum = jnp.dot(gm, a, preferred_element_type=jnp.float32)        # (C,256)
        gsq = jnp.dot(gm, a * a, preferred_element_type=jnp.float32)     # (C,256)
        mean = jnp.sum(gsum, axis=1, keepdims=True) / denom              # (C,1)
        msq = jnp.sum(gsq, axis=1, keepdims=True) / denom
        var = jnp.maximum(msq - mean * mean, 0.0)
        inv = jax.lax.rsqrt(var + EPS)
        y = (a - mean) * (inv * gamma) + beta
        return y * jax.nn.sigmoid(y)                                     # SiLU

    def taps9(a):
        # 3x3 neighborhood taps via XLU lane rotations + hoisted border masks.
        cols = []
        k = 0
        for dy in (-1, 0, 1):
            for dx in (-1, 0, 1):
                shift = dy * W + dx
                t = a if shift == 0 else pltpu.roll(a, (-shift) % HW, axis=1)
                if k != 4:                        # centre tap needs no mask
                    t = t * mask_ref[k:k + 1, :]
                cols.append(t)
                k += 1
        return jnp.concatenate(cols, axis=0)      # (9*C, 256), sublane stack

    def conv3x3(a, w_t, b):
        patches = taps9(a).astype(jnp.bfloat16)
        return jnp.dot(w_t, patches, preferred_element_type=jnp.float32) + b

    # ---- ResnetBlock2D (temb=None, dropout p=0) ----
    a1 = gn_silu(x2d, gm1_ref[...], g1_ref[...], be1_ref[...], IN_CH // GROUPS)
    h = conv3x3(a1, w1_ref[...], b1_ref[...])                       # (16, 256)
    a2 = gn_silu(h, gm2_ref[...], g2_ref[...], be2_ref[...], OUT_CH // GROUPS)
    h = conv3x3(a2, w2_ref[...], b2_ref[...])                       # (16, 256)
    sc = jnp.dot(ws_ref[...], x2d.astype(jnp.bfloat16),
                 preferred_element_type=jnp.float32) + bs_ref[...]
    h1 = (sc + h) * (1.0 / OUT_SCALE)                               # (16, 256)

    # ---- Downsample2D: 3x3 conv, stride 2, pad 1 ----
    # Full-res conv (same roll/mask tap machinery), then the hoisted even-pixel
    # selector picks the stride-2 outputs.  TODO(synk): strided lane picks.
    hd = jnp.dot(wd_ref[...], taps9(h1).astype(jnp.bfloat16),
                 preferred_element_type=jnp.float32)                # (16, 256)
    o_ref[0] = jnp.dot(hd, sel_ref[...],
                       preferred_element_type=jnp.float32) + bd_ref[...]


# ------------------------------ public wrapper -------------------------------
def down_encoder_block_2d(x_nchw, p):
    """Matches DownEncoderBlock2D.forward: NCHW in, NCHW (H/2, W/2) out."""
    n = x_nchw.shape[0]
    x = x_nchw.reshape(n, IN_CH, HW).astype(jnp.float32)   # lane-dense, no transpose

    bf = jnp.bfloat16
    w1t = p["conv1_w"].reshape(9 * IN_CH, OUT_CH).T.astype(bf)    # (16, 72)
    w2t = p["conv2_w"].reshape(9 * OUT_CH, OUT_CH).T.astype(bf)   # (16, 144)
    wst = p["short_w"].reshape(IN_CH, OUT_CH).T.astype(bf)        # (16, 8)
    wdt = p["down_w"].reshape(9 * OUT_CH, OUT_CH).T.astype(bf)    # (16, 144)
    col = lambda v: v.reshape(-1, 1).astype(jnp.float32)

    masks = jnp.asarray(_tap_masks())                             # (9, 256)
    sel = jnp.asarray(_even_pixel_selector())                     # (256, 64)
    gm1 = jnp.asarray(_group_matrix(IN_CH))                       # (8, 8)
    gm2 = jnp.asarray(_group_matrix(OUT_CH))                      # (16, 16)

    def cspec(shape):
        return pl.BlockSpec(shape, lambda i: (0, 0))

    out = pl.pallas_call(
        _fused_down_encoder_kernel,
        out_shape=jax.ShapeDtypeStruct((n, OUT_CH, HO * WO), jnp.float32),
        grid=(n,),
        in_specs=[
            pl.BlockSpec((1, IN_CH, HW), lambda i: (i, 0, 0)),    # x
            cspec((IN_CH, IN_CH)),                                # GN1 group matrix
            cspec((IN_CH, 1)), cspec((IN_CH, 1)),                 # norm1 gamma/beta
            cspec((OUT_CH, 9 * IN_CH)), cspec((OUT_CH, 1)),       # conv1 w,b
            cspec((OUT_CH, OUT_CH)),                              # GN2 group matrix
            cspec((OUT_CH, 1)), cspec((OUT_CH, 1)),               # norm2 gamma/beta
            cspec((OUT_CH, 9 * OUT_CH)), cspec((OUT_CH, 1)),      # conv2 w,b
            cspec((OUT_CH, IN_CH)), cspec((OUT_CH, 1)),           # shortcut w,b
            cspec((OUT_CH, 9 * OUT_CH)), cspec((OUT_CH, 1)),      # down w,b
            cspec((9, HW)),                                       # 3x3 border masks
            cspec((HW, HO * WO)),                                 # even-pixel selector
        ],
        out_specs=pl.BlockSpec((1, OUT_CH, HO * WO), lambda i: (i, 0, 0)),
        compiler_params=pltpu.CompilerParams(
            dimension_semantics=("parallel",)),
    )(x,
      gm1, col(p["norm1_g"]), col(p["norm1_b"]), w1t, col(p["conv1_b"]),
      gm2, col(p["norm2_g"]), col(p["norm2_b"]), w2t, col(p["conv2_b"]),
      wst, col(p["short_b"]), wdt, col(p["down_b"]),
      masks, sel)

    return out.reshape(n, OUT_CH, HO, WO)                         # NCHW, metadata only


# -------------------------- pure-JAX reference -------------------------------
def _ref_down_encoder_block(x_nchw, p):
    x = jnp.transpose(x_nchw, (0, 2, 3, 1))

    def gn(z, g, b):
        n_, h_, w_, c_ = z.shape
        zg = z.reshape(n_, h_, w_, GROUPS, c_ // GROUPS)
        m = zg.mean(axis=(1, 2, 4), keepdims=True)
        v = ((zg - m) ** 2).mean(axis=(1, 2, 4), keepdims=True)
        y = (zg - m) / jnp.sqrt(v + EPS)
        return y.reshape(n_, h_, w_, c_) * g + b

    silu = lambda z: z * jax.nn.sigmoid(z)

    def conv(z, wt, b, stride=1, pad=1):
        return jax.lax.conv_general_dilated(
            z, wt, (stride, stride), [(pad, pad), (pad, pad)],
            dimension_numbers=("NHWC", "HWIO", "NHWC"),
            precision=jax.lax.Precision.HIGHEST) + b

    h = conv(silu(gn(x, p["norm1_g"], p["norm1_b"])), p["conv1_w"], p["conv1_b"])
    h = conv(silu(gn(h, p["norm2_g"], p["norm2_b"])), p["conv2_w"], p["conv2_b"])
    sc = conv(x, p["short_w"], p["short_b"], pad=0)
    h1 = (sc + h) / OUT_SCALE
    h2 = conv(h1, p["down_w"], p["down_b"], stride=2, pad=1)
    return jnp.transpose(h2, (0, 3, 1, 2))


# --------------------------------- main ---------------------------------------
if __name__ == "__main__":
    key = jax.random.PRNGKey(0)
    ks = jax.random.split(key, 14)

    def nrm(k, shape, scale=0.05):
        return scale * jax.random.normal(k, shape, jnp.float32)

    params = {
        "norm1_g": 1.0 + 0.1 * jax.random.normal(ks[0], (IN_CH,), jnp.float32),
        "norm1_b": 0.1 * jax.random.normal(ks[1], (IN_CH,), jnp.float32),
        "conv1_w": nrm(ks[2], (3, 3, IN_CH, OUT_CH)),
        "conv1_b": nrm(ks[3], (OUT_CH,)),
        "norm2_g": 1.0 + 0.1 * jax.random.normal(ks[4], (OUT_CH,), jnp.float32),
        "norm2_b": 0.1 * jax.random.normal(ks[5], (OUT_CH,), jnp.float32),
        "conv2_w": nrm(ks[6], (3, 3, OUT_CH, OUT_CH)),
        "conv2_b": nrm(ks[7], (OUT_CH,)),
        "short_w": nrm(ks[8], (1, 1, IN_CH, OUT_CH)),
        "short_b": nrm(ks[9], (OUT_CH,)),
        "down_w": nrm(ks[10], (3, 3, OUT_CH, OUT_CH)),
        "down_b": nrm(ks[11], (OUT_CH,)),
    }

    x = jax.random.normal(ks[12], (N, IN_CH, H, W), jnp.float32)  # NCHW like PyTorch

    fwd = jax.jit(down_encoder_block_2d)
    out = fwd(x, params)
    jax.block_until_ready(out)

    ref = _ref_down_encoder_block(x, params)
    assert out.shape == (N, OUT_CH, H // 2, W // 2), out.shape
    # bf16 MXU operands + f32 accumulation in the kernel vs an f32 reference.
    assert jnp.allclose(out, ref, atol=1e-2, rtol=2e-2), float(
        jnp.max(jnp.abs(out - ref)))

    print("KERNEL_OK")
</pallas_src>

<mosaic_0001>
module attributes {stable_mosaic.version = 11 : i64} {
  func.func @_fused_down_encoder_kernel(%arg0: i32, %arg1: memref<1x8x256xf32, #tpu.memory_space<vmem>>, %arg2: memref<8x8xf32, #tpu.memory_space<vmem>>, %arg3: memref<8x1xf32, #tpu.memory_space<vmem>>, %arg4: memref<8x1xf32, #tpu.memory_space<vmem>>, %arg5: memref<16x72xbf16, #tpu.memory_space<vmem>>, %arg6: memref<16x1xf32, #tpu.memory_space<vmem>>, %arg7: memref<16x16xf32, #tpu.memory_space<vmem>>, %arg8: memref<16x1xf32, #tpu.memory_space<vmem>>, %arg9: memref<16x1xf32, #tpu.memory_space<vmem>>, %arg10: memref<16x144xbf16, #tpu.memory_space<vmem>>, %arg11: memref<16x1xf32, #tpu.memory_space<vmem>>, %arg12: memref<16x8xbf16, #tpu.memory_space<vmem>>, %arg13: memref<16x1xf32, #tpu.memory_space<vmem>>, %arg14: memref<16x144xbf16, #tpu.memory_space<vmem>>, %arg15: memref<16x1xf32, #tpu.memory_space<vmem>>, %arg16: memref<9x256xf32, #tpu.memory_space<vmem>>, %arg17: memref<256x64xf32, #tpu.memory_space<vmem>>, %arg18: memref<1x16x64xf32, #tpu.memory_space<vmem>>) attributes {dimension_semantics = [#tpu.dimension_semantics<parallel>], iteration_bounds = array<i64: 2>, scalar_prefetch = 0 : i64, scratch_operands = 0 : i64, tpu.core_type = #tpu.core_type<tc>, window_params = [{transform_indices = @transform_0, window_bounds = array<i64: 1, 8, 256>}, {pipeline_mode = #tpu.pipeline_mode<synchronous>, transform_indices = @transform_1, window_bounds = array<i64: 8, 8>}, {pipeline_mode = #tpu.pipeline_mode<synchronous>, transform_indices = @transform_2, window_bounds = array<i64: 8, 1>}, {pipeline_mode = #tpu.pipeline_mode<synchronous>, transform_indices = @transform_3, window_bounds = array<i64: 8, 1>}, {pipeline_mode = #tpu.pipeline_mode<synchronous>, transform_indices = @transform_4, window_bounds = array<i64: 16, 72>}, {pipeline_mode = #tpu.pipeline_mode<synchronous>, transform_indices = @transform_5, window_bounds = array<i64: 16, 1>}, {pipeline_mode = #tpu.pipeline_mode<synchronous>, transform_indices = @transform_6, window_bounds = array<i64: 16, 16>}, {pipeline_mode = #tpu.pipeline_mode<synchronous>, transform_indices = @transform_7, window_bounds = array<i64: 16, 1>}, {pipeline_mode = #tpu.pipeline_mode<synchronous>, transform_indices = @transform_8, window_bounds = array<i64: 16, 1>}, {pipeline_mode = #tpu.pipeline_mode<synchronous>, transform_indices = @transform_9, window_bounds = array<i64: 16, 144>}, {pipeline_mode = #tpu.pipeline_mode<synchronous>, transform_indices = @transform_10, window_bounds = array<i64: 16, 1>}, {pipeline_mode = #tpu.pipeline_mode<synchronous>, transform_indices = @transform_11, window_bounds = array<i64: 16, 8>}, {pipeline_mode = #tpu.pipeline_mode<synchronous>, transform_indices = @transform_12, window_bounds = array<i64: 16, 1>}, {pipeline_mode = #tpu.pipeline_mode<synchronous>, transform_indices = @transform_13, window_bounds = array<i64: 16, 144>}, {pipeline_mode = #tpu.pipeline_mode<synchronous>, transform_indices = @transform_14, window_bounds = array<i64: 16, 1>}, {pipeline_mode = #tpu.pipeline_mode<synchronous>, transform_indices = @transform_15, window_bounds = array<i64: 9, 256>}, {pipeline_mode = #tpu.pipeline_mode<synchronous>, transform_indices = @transform_16, window_bounds = array<i64: 256, 64>}, {transform_indices = @transform_17, window_bounds = array<i64: 1, 16, 64>}]} {
    %c0 = arith.constant 0 : index
    %c0_0 = arith.constant 0 : index
    %c0_1 = arith.constant 0 : index
    %0 = vector.load %arg1[%c0, %c0_0, %c0_1] : memref<1x8x256xf32, #tpu.memory_space<vmem>>, vector<1x8x256xf32>
    %1 = vector.shape_cast %0 : vector<1x8x256xf32> to vector<8x256xf32>
    %c0_2 = arith.constant 0 : index
    %c0_3 = arith.constant 0 : index
    %2 = vector.load %arg2[%c0_2, %c0_3] : memref<8x8xf32, #tpu.memory_space<vmem>>, vector<8x8xf32>
    %c0_4 = arith.constant 0 : index
    %c0_5 = arith.constant 0 : index
    %3 = vector.load %arg3[%c0_4, %c0_5] : memref<8x1xf32, #tpu.memory_space<vmem>>, vector<8x1xf32>
    %c0_6 = arith.constant 0 : index
    %c0_7 = arith.constant 0 : index
    %4 = vector.load %arg4[%c0_6, %c0_7] : memref<8x1xf32, #tpu.memory_space<vmem>>, vector<8x1xf32>
    %cst = arith.constant dense<0.000000e+00> : vector<8x256xf32>
    %5 = tpu.matmul %2, %1, %cst {dimension_numbers = #tpu.dot_dimension_numbers<[1], [0], [0], [1], [0, 0, 1, 1], [], []>} : vector<8x8xf32>, vector<8x256xf32>, vector<8x256xf32> -> vector<8x256xf32>
    %6 = arith.mulf %1, %1 : vector<8x256xf32>
    %cst_8 = arith.constant dense<0.000000e+00> : vector<8x256xf32>
    %7 = tpu.matmul %2, %6, %cst_8 {dimension_numbers = #tpu.dot_dimension_numbers<[1], [0], [0], [1], [0, 0, 1, 1], [], []>} : vector<8x8xf32>, vector<8x256xf32>, vector<8x256xf32> -> vector<8x256xf32>
    %cst_9 = arith.constant dense<0.000000e+00> : vector<8xf32>
    %8 = vector.multi_reduction <add>, %5, %cst_9 [1] : vector<8x256xf32> to vector<8xf32>
    %9 = vector.shape_cast %8 : vector<8xf32> to vector<8x1xf32>
    %cst_10 = arith.constant 5.120000e+02 : f32
    %10 = vector.broadcast %cst_10 : f32 to vector<8x1xf32>
    %11 = arith.divf %9, %10 : vector<8x1xf32>
    %cst_11 = arith.constant dense<0.000000e+00> : vector<8xf32>
    %12 = vector.multi_reduction <add>, %7, %cst_11 [1] : vector<8x256xf32> to vector<8xf32>
    %13 = vector.shape_cast %12 : vector<8xf32> to vector<8x1xf32>
    %cst_12 = arith.constant 5.120000e+02 : f32
    %14 = vector.broadcast %cst_12 : f32 to vector<8x1xf32>
    %15 = arith.divf %13, %14 : vector<8x1xf32>
    %16 = arith.mulf %11, %11 : vector<8x1xf32>
    %17 = arith.subf %15, %16 : vector<8x1xf32>
    %cst_13 = arith.constant 0.000000e+00 : f32
    %18 = vector.broadcast %cst_13 : f32 to vector<8x1xf32>
    %19 = arith.maximumf %17, %18 : vector<8x1xf32>
    %cst_14 = arith.constant 9.99999997E-7 : f32
    %20 = vector.broadcast %cst_14 : f32 to vector<8x1xf32>
    %21 = arith.addf %19, %20 : vector<8x1xf32>
    %22 = math.rsqrt %21 : vector<8x1xf32>
    %23 = vector.broadcast %11 : vector<8x1xf32> to vector<8x256xf32>
    %24 = arith.subf %1, %23 : vector<8x256xf32>
    %25 = arith.mulf %22, %3 : vector<8x1xf32>
    %26 = vector.broadcast %25 : vector<8x1xf32> to vector<8x256xf32>
    %27 = arith.mulf %24, %26 : vector<8x256xf32>
    %28 = vector.broadcast %4 : vector<8x1xf32> to vector<8x256xf32>
    %29 = arith.addf %27, %28 : vector<8x256xf32>
    %30 = arith.negf %29 : vector<8x256xf32>
    %31 = math.exp %30 : vector<8x256xf32>
    %cst_15 = arith.constant 1.000000e+00 : f32
    %32 = vector.broadcast %cst_15 : f32 to vector<8x256xf32>
    %33 = arith.addf %32, %31 : vector<8x256xf32>
    %34 = arith.divf %32, %33 : vector<8x256xf32>
    %35 = arith.mulf %29, %34 : vector<8x256xf32>
    %c0_16 = arith.constant 0 : index
    %c0_17 = arith.constant 0 : index
    %36 = vector.load %arg5[%c0_16, %c0_17] : memref<16x72xbf16, #tpu.memory_space<vmem>>, vector<16x72xbf16>
    %c0_18 = arith.constant 0 : index
    %c0_19 = arith.constant 0 : index
    %37 = vector.load %arg6[%c0_18, %c0_19] : memref<16x1xf32, #tpu.memory_space<vmem>>, vector<16x1xf32>
    %c17_i32 = arith.constant 17 : i32
    %38 = tpu.dynamic_rotate %35 by %c17_i32 dim 1 : vector<8x256xf32>, i32 -> vector<8x256xf32>
    %c0_20 = arith.constant 0 : index
    %c0_21 = arith.constant 0 : index
    %39 = vector.load %arg16[%c0_20, %c0_21] : memref<9x256xf32, #tpu.memory_space<vmem>>, vector<1x256xf32>
    %40 = vector.broadcast %39 : vector<1x256xf32> to vector<8x256xf32>
    %41 = arith.mulf %38, %40 : vector<8x256xf32>
    %c16_i32 = arith.constant 16 : i32
    %42 = tpu.dynamic_rotate %35 by %c16_i32 dim 1 : vector<8x256xf32>, i32 -> vector<8x256xf32>
    %c1 = arith.constant 1 : index
    %c0_22 = arith.constant 0 : index
    %43 = vector.load %arg16[%c1, %c0_22] : memref<9x256xf32, #tpu.memory_space<vmem>>, vector<1x256xf32>
    %44 = vector.broadcast %43 : vector<1x256xf32> to vector<8x256xf32>
    %45 = arith.mulf %42, %44 : vector<8x256xf32>
    %c15_i32 = arith.constant 15 : i32
    %46 = tpu.dynamic_rotate %35 by %c15_i32 dim 1 : vector<8x256xf32>, i32 -> vector<8x256xf32>
    %c2 = arith.constant 2 : index
    %c0_23 = arith.constant 0 : index
    %47 = vector.load %arg16[%c2, %c0_23] : memref<9x256xf32, #tpu.memory_space<vmem>>, vector<1x256xf32>
    %48 = vector.broadcast %47 : vector<1x256xf32> to vector<8x256xf32>
    %49 = arith.mulf %46, %48 : vector<8x256xf32>
    %c1_i32 = arith.constant 1 : i32
    %50 = tpu.dynamic_rotate %35 by %c1_i32 dim 1 : vector<8x256xf32>, i32 -> vector<8x256xf32>
    %c3 = arith.constant 3 : index
    %c0_24 = arith.constant 0 : index
    %51 = vector.load %arg16[%c3, %c0_24] : memref<9x256xf32, #tpu.memory_space<vmem>>, vector<1x256xf32>
    %52 = vector.broadcast %51 : vector<1x256xf32> to vector<8x256xf32>
    %53 = arith.mulf %50, %52 : vector<8x256xf32>
    %c255_i32 = arith.constant 255 : i32
    %54 = tpu.dynamic_rotate %35 by %c255_i32 dim 1 : vector<8x256xf32>, i32 -> vector<8x256xf32>
    %c5 = arith.constant 5 : index
    %c0_25 = arith.constant 0 : index
    %55 = vector.load %arg16[%c5, %c0_25] : memref<9x256xf32, #tpu.memory_space<vmem>>, vector<1x256xf32>
    %56 = vector.broadcast %55 : vector<1x256xf32> to vector<8x256xf32>
    %57 = arith.mulf %54, %56 : vector<8x256xf32>
    %c241_i32 = arith.constant 241 : i32
    %58 = tpu.dynamic_rotate %35 by %c241_i32 dim 1 : vector<8x256xf32>, i32 -> vector<8x256xf32>
    %c6 = arith.constant 6 : index
    %c0_26 = arith.constant 0 : index
    %59 = vector.load %arg16[%c6, %c0_26] : memref<9x256xf32, #tpu.memory_space<vmem>>, vector<1x256xf32>
    %60 = vector.broadcast %59 : vector<1x256xf32> to vector<8x256xf32>
    %61 = arith.mulf %58, %60 : vector<8x256xf32>
    %c240_i32 = arith.constant 240 : i32
    %62 = tpu.dynamic_rotate %35 by %c240_i32 dim 1 : vector<8x256xf32>, i32 -> vector<8x256xf32>
    %c7 = arith.constant 7 : index
    %c0_27 = arith.constant 0 : index
    %63 = vector.load %arg16[%c7, %c0_27] : memref<9x256xf32, #tpu.memory_space<vmem>>, vector<1x256xf32>
    %64 = vector.broadcast %63 : vector<1x256xf32> to vector<8x256xf32>
    %65 = arith.mulf %62, %64 : vector<8x256xf32>
    %c239_i32 = arith.constant 239 : i32
    %66 = tpu.dynamic_rotate %35 by %c239_i32 dim 1 : vector<8x256xf32>, i32 -> vector<8x256xf32>
    %c8 = arith.constant 8 : index
    %c0_28 = arith.constant 0 : index
    %67 = vector.load %arg16[%c8, %c0_28] : memref<9x256xf32, #tpu.memory_space<vmem>>, vector<1x256xf32>
    %68 = vector.broadcast %67 : vector<1x256xf32> to vector<8x256xf32>
    %69 = arith.mulf %66, %68 : vector<8x256xf32>
    %70 = tpu.concatenate %41, %45, %49, %53, %35, %57, %61, %65, %69 in 0 : vector<8x256xf32>, vector<8x256xf32>, vector<8x256xf32>, vector<8x256xf32>, vector<8x256xf32>, vector<8x256xf32>, vector<8x256xf32>, vector<8x256xf32>, vector<8x256xf32> -> vector<72x256xf32>
    %71 = arith.truncf %70 : vector<72x256xf32> to vector<72x256xbf16>
    %cst_29 = arith.constant dense<0.000000e+00> : vector<16x256xf32>
    %72 = tpu.matmul %36, %71, %cst_29 {dimension_numbers = #tpu.dot_dimension_numbers<[1], [0], [0], [1], [0, 0, 1, 1], [], []>} : vector<16x72xbf16>, vector<72x256xbf16>, vector<16x256xf32> -> vector<16x256xf32>
    %73 = vector.broadcast %37 : vector<16x1xf32> to vector<16x256xf32>
    %74 = arith.addf %72, %73 : vector<16x256xf32>
    %c0_30 = arith.constant 0 : index
    %c0_31 = arith.constant 0 : index
    %75 = vector.load %arg7[%c0_30, %c0_31] : memref<16x16xf32, #tpu.memory_space<vmem>>, vector<16x16xf32>
    %c0_32 = arith.constant 0 : index
    %c0_33 = arith.constant 0 : index
    %76 = vector.load %arg8[%c0_32, %c0_33] : memref<16x1xf32, #tpu.memory_space<vmem>>, vector<16x1xf32>
    %c0_34 = arith.constant 0 : index
    %c0_35 = arith.constant 0 : index
    %77 = vector.load %arg9[%c0_34, %c0_35] : memref<16x1xf32, #tpu.memory_space<vmem>>, vector<16x1xf32>
    %cst_36 = arith.constant dense<0.000000e+00> : vector<16x256xf32>
    %78 = tpu.matmul %75, %74, %cst_36 {dimension_numbers = #tpu.dot_dimension_numbers<[1], [0], [0], [1], [0, 0, 1, 1], [], []>} : vector<16x16xf32>, vector<16x256xf32>, vector<16x256xf32> -> vector<16x256xf32>
    %79 = arith.mulf %74, %74 : vector<16x256xf32>
    %cst_37 = arith.constant dense<0.000000e+00> : vector<16x256xf32>
    %80 = tpu.matmul %75, %79, %cst_37 {dimension_numbers = #tpu.dot_dimension_numbers<[1], [0], [0], [1], [0, 0, 1, 1], [], []>} : vector<16x16xf32>, vector<16x256xf32>, vector<16x256xf32> -> vector<16x256xf32>
    %cst_38 = arith.constant dense<0.000000e+00> : vector<16xf32>
    %81 = vector.multi_reduction <add>, %78, %cst_38 [1] : vector<16x256xf32> to vector<16xf32>
    %82 = vector.shape_cast %81 : vector<16xf32> to vector<16x1xf32>
    %cst_39 = arith.constant 1.024000e+03 : f32
    %83 = vector.broadcast %cst_39 : f32 to vector<16x1xf32>
    %84 = arith.divf %82, %83 : vector<16x1xf32>
    %cst_40 = arith.constant dense<0.000000e+00> : vector<16xf32>
    %85 = vector.multi_reduction <add>, %80, %cst_40 [1] : vector<16x256xf32> to vector<16xf32>
    %86 = vector.shape_cast %85 : vector<16xf32> to vector<16x1xf32>
    %cst_41 = arith.constant 1.024000e+03 : f32
    %87 = vector.broadcast %cst_41 : f32 to vector<16x1xf32>
    %88 = arith.divf %86, %87 : vector<16x1xf32>
    %89 = arith.mulf %84, %84 : vector<16x1xf32>
    %90 = arith.subf %88, %89 : vector<16x1xf32>
    %cst_42 = arith.constant 0.000000e+00 : f32
    %91 = vector.broadcast %cst_42 : f32 to vector<16x1xf32>
    %92 = arith.maximumf %90, %91 : vector<16x1xf32>
    %cst_43 = arith.constant 9.99999997E-7 : f32
    %93 = vector.broadcast %cst_43 : f32 to vector<16x1xf32>
    %94 = arith.addf %92, %93 : vector<16x1xf32>
    %95 = math.rsqrt %94 : vector<16x1xf32>
    %96 = vector.broadcast %84 : vector<16x1xf32> to vector<16x256xf32>
    %97 = arith.subf %74, %96 : vector<16x256xf32>
    %98 = arith.mulf %95, %76 : vector<16x1xf32>
    %99 = vector.broadcast %98 : vector<16x1xf32> to vector<16x256xf32>
    %100 = arith.mulf %97, %99 : vector<16x256xf32>
    %101 = vector.broadcast %77 : vector<16x1xf32> to vector<16x256xf32>
    %102 = arith.addf %100, %101 : vector<16x256xf32>
    %103 = arith.negf %102 : vector<16x256xf32>
    %104 = math.exp %103 : vector<16x256xf32>
    %cst_44 = arith.constant 1.000000e+00 : f32
    %105 = vector.broadcast %cst_44 : f32 to vector<16x256xf32>
    %106 = arith.addf %105, %104 : vector<16x256xf32>
    %107 = arith.divf %105, %106 : vector<16x256xf32>
    %108 = arith.mulf %102, %107 : vector<16x256xf32>
    %c0_45 = arith.constant 0 : index
    %c0_46 = arith.constant 0 : index
    %109 = vector.load %arg10[%c0_45, %c0_46] : memref<16x144xbf16, #tpu.memory_space<vmem>>, vector<16x144xbf16>
    %c0_47 = arith.constant 0 : index
    %c0_48 = arith.constant 0 : index
    %110 = vector.load %arg11[%c0_47, %c0_48] : memref<16x1xf32, #tpu.memory_space<vmem>>, vector<16x1xf32>
    %c17_i32_49 = arith.constant 17 : i32
    %111 = tpu.dynamic_rotate %108 by %c17_i32_49 dim 1 : vector<16x256xf32>, i32 -> vector<16x256xf32>
    %c0_50 = arith.constant 0 : index
    %c0_51 = arith.constant 0 : index
    %112 = vector.load %arg16[%c0_50, %c0_51] : memref<9x256xf32, #tpu.memory_space<vmem>>, vector<1x256xf32>
    %113 = vector.broadcast %112 : vector<1x256xf32> to vector<16x256xf32>
    %114 = arith.mulf %111, %113 : vector<16x256xf32>
    %c16_i32_52 = arith.constant 16 : i32
    %115 = tpu.dynamic_rotate %108 by %c16_i32_52 dim 1 : vector<16x256xf32>, i32 -> vector<16x256xf32>
    %c1_53 = arith.constant 1 : index
    %c0_54 = arith.constant 0 : index
    %116 = vector.load %arg16[%c1_53, %c0_54] : memref<9x256xf32, #tpu.memory_space<vmem>>, vector<1x256xf32>
    %117 = vector.broadcast %116 : vector<1x256xf32> to vector<16x256xf32>
    %118 = arith.mulf %115, %117 : vector<16x256xf32>
    %c15_i32_55 = arith.constant 15 : i32
    %119 = tpu.dynamic_rotate %108 by %c15_i32_55 dim 1 : vector<16x256xf32>, i32 -> vector<16x256xf32>
    %c2_56 = arith.constant 2 : index
    %c0_57 = arith.constant 0 : index
    %120 = vector.load %arg16[%c2_56, %c0_57] : memref<9x256xf32, #tpu.memory_space<vmem>>, vector<1x256xf32>
    %121 = vector.broadcast %120 : vector<1x256xf32> to vector<16x256xf32>
    %122 = arith.mulf %119, %121 : vector<16x256xf32>
    %c1_i32_58 = arith.constant 1 : i32
    %123 = tpu.dynamic_rotate %108 by %c1_i32_58 dim 1 : vector<16x256xf32>, i32 -> vector<16x256xf32>
    %c3_59 = arith.constant 3 : index
    %c0_60 = arith.constant 0 : index
    %124 = vector.load %arg16[%c3_59, %c0_60] : memref<9x256xf32, #tpu.memory_space<vmem>>, vector<1x256xf32>
    %125 = vector.broadcast %124 : vector<1x256xf32> to vector<16x256xf32>
    %126 = arith.mulf %123, %125 : vector<16x256xf32>
    %c255_i32_61 = arith.constant 255 : i32
    %127 = tpu.dynamic_rotate %108 by %c255_i32_61 dim 1 : vector<16x256xf32>, i32 -> vector<16x256xf32>
    %c5_62 = arith.constant 5 : index
    %c0_63 = arith.constant 0 : index
    %128 = vector.load %arg16[%c5_62, %c0_63] : memref<9x256xf32, #tpu.memory_space<vmem>>, vector<1x256xf32>
    %129 = vector.broadcast %128 : vector<1x256xf32> to vector<16x256xf32>
    %130 = arith.mulf %127, %129 : vector<16x256xf32>
    %c241_i32_64 = arith.constant 241 : i32
    %131 = tpu.dynamic_rotate %108 by %c241_i32_64 dim 1 : vector<16x256xf32>, i32 -> vector<16x256xf32>
    %c6_65 = arith.constant 6 : index
    %c0_66 = arith.constant 0 : index
    %132 = vector.load %arg16[%c6_65, %c0_66] : memref<9x256xf32, #tpu.memory_space<vmem>>, vector<1x256xf32>
    %133 = vector.broadcast %132 : vector<1x256xf32> to vector<16x256xf32>
    %134 = arith.mulf %131, %133 : vector<16x256xf32>
    %c240_i32_67 = arith.constant 240 : i32
    %135 = tpu.dynamic_rotate %108 by %c240_i32_67 dim 1 : vector<16x256xf32>, i32 -> vector<16x256xf32>
    %c7_68 = arith.constant 7 : index
    %c0_69 = arith.constant 0 : index
    %136 = vector.load %arg16[%c7_68, %c0_69] : memref<9x256xf32, #tpu.memory_space<vmem>>, vector<1x256xf32>
    %137 = vector.broadcast %136 : vector<1x256xf32> to vector<16x256xf32>
    %138 = arith.mulf %135, %137 : vector<16x256xf32>
    %c239_i32_70 = arith.constant 239 : i32
    %139 = tpu.dynamic_rotate %108 by %c239_i32_70 dim 1 : vector<16x256xf32>, i32 -> vector<16x256xf32>
    %c8_71 = arith.constant 8 : index
    %c0_72 = arith.constant 0 : index
    %140 = vector.load %arg16[%c8_71, %c0_72] : memref<9x256xf32, #tpu.memory_space<vmem>>, vector<1x256xf32>
    %141 = vector.broadcast %140 : vector<1x256xf32> to vector<16x256xf32>
    %142 = arith.mulf %139, %141 : vector<16x256xf32>
    %143 = tpu.concatenate %114, %118, %122, %126, %108, %130, %134, %138, %142 in 0 : vector<16x256xf32>, vector<16x256xf32>, vector<16x256xf32>, vector<16x256xf32>, vector<16x256xf32>, vector<16x256xf32>, vector<16x256xf32>, vector<16x256xf32>, vector<16x256xf32> -> vector<144x256xf32>
    %144 = arith.truncf %143 : vector<144x256xf32> to vector<144x256xbf16>
    %cst_73 = arith.constant dense<0.000000e+00> : vector<16x256xf32>
    %145 = tpu.matmul %109, %144, %cst_73 {dimension_numbers = #tpu.dot_dimension_numbers<[1], [0], [0], [1], [0, 0, 1, 1], [], []>} : vector<16x144xbf16>, vector<144x256xbf16>, vector<16x256xf32> -> vector<16x256xf32>
    %146 = vector.broadcast %110 : vector<16x1xf32> to vector<16x256xf32>
    %147 = arith.addf %145, %146 : vector<16x256xf32>
    %c0_74 = arith.constant 0 : index
    %c0_75 = arith.constant 0 : index
    %148 = vector.load %arg12[%c0_74, %c0_75] : memref<16x8xbf16, #tpu.memory_space<vmem>>, vector<16x8xbf16>
    %149 = arith.truncf %1 : vector<8x256xf32> to vector<8x256xbf16>
    %cst_76 = arith.constant dense<0.000000e+00> : vector<16x256xf32>
    %150 = tpu.matmul %148, %149, %cst_76 {dimension_numbers = #tpu.dot_dimension_numbers<[1], [0], [0], [1], [0, 0, 1, 1], [], []>} : vector<16x8xbf16>, vector<8x256xbf16>, vector<16x256xf32> -> vector<16x256xf32>
    %c0_77 = arith.constant 0 : index
    %c0_78 = arith.constant 0 : index
    %151 = vector.load %arg13[%c0_77, %c0_78] : memref<16x1xf32, #tpu.memory_space<vmem>>, vector<16x1xf32>
    %152 = vector.broadcast %151 : vector<16x1xf32> to vector<16x256xf32>
    %153 = arith.addf %150, %152 : vector<16x256xf32>
    %154 = arith.addf %153, %147 : vector<16x256xf32>
    %cst_79 = arith.constant 1.000000e+00 : f32
    %155 = vector.broadcast %cst_79 : f32 to vector<16x256xf32>
    %156 = arith.mulf %154, %155 : vector<16x256xf32>
    %c0_80 = arith.constant 0 : index
    %c0_81 = arith.constant 0 : index
    %157 = vector.load %arg14[%c0_80, %c0_81] : memref<16x144xbf16, #tpu.memory_space<vmem>>, vector<16x144xbf16>
    %c17_i32_82 = arith.constant 17 : i32
    %158 = tpu.dynamic_rotate %156 by %c17_i32_82 dim 1 : vector<16x256xf32>, i32 -> vector<16x256xf32>
    %c0_83 = arith.constant 0 : index
    %c0_84 = arith.constant 0 : index
    %159 = vector.load %arg16[%c0_83, %c0_84] : memref<9x256xf32, #tpu.memory_space<vmem>>, vector<1x256xf32>
    %160 = vector.broadcast %159 : vector<1x256xf32> to vector<16x256xf32>
    %161 = arith.mulf %158, %160 : vector<16x256xf32>
    %c16_i32_85 = arith.constant 16 : i32
    %162 = tpu.dynamic_rotate %156 by %c16_i32_85 dim 1 : vector<16x256xf32>, i32 -> vector<16x256xf32>
    %c1_86 = arith.constant 1 : index
    %c0_87 = arith.constant 0 : index
    %163 = vector.load %arg16[%c1_86, %c0_87] : memref<9x256xf32, #tpu.memory_space<vmem>>, vector<1x256xf32>
    %164 = vector.broadcast %163 : vector<1x256xf32> to vector<16x256xf32>
    %165 = arith.mulf %162, %164 : vector<16x256xf32>
    %c15_i32_88 = arith.constant 15 : i32
    %166 = tpu.dynamic_rotate %156 by %c15_i32_88 dim 1 : vector<16x256xf32>, i32 -> vector<16x256xf32>
    %c2_89 = arith.constant 2 : index
    %c0_90 = arith.constant 0 : index
    %167 = vector.load %arg16[%c2_89, %c0_90] : memref<9x256xf32, #tpu.memory_space<vmem>>, vector<1x256xf32>
    %168 = vector.broadcast %167 : vector<1x256xf32> to vector<16x256xf32>
    %169 = arith.mulf %166, %168 : vector<16x256xf32>
    %c1_i32_91 = arith.constant 1 : i32
    %170 = tpu.dynamic_rotate %156 by %c1_i32_91 dim 1 : vector<16x256xf32>, i32 -> vector<16x256xf32>
    %c3_92 = arith.constant 3 : index
    %c0_93 = arith.constant 0 : index
    %171 = vector.load %arg16[%c3_92, %c0_93] : memref<9x256xf32, #tpu.memory_space<vmem>>, vector<1x256xf32>
    %172 = vector.broadcast %171 : vector<1x256xf32> to vector<16x256xf32>
    %173 = arith.mulf %170, %172 : vector<16x256xf32>
    %c255_i32_94 = arith.constant 255 : i32
    %174 = tpu.dynamic_rotate %156 by %c255_i32_94 dim 1 : vector<16x256xf32>, i32 -> vector<16x256xf32>
    %c5_95 = arith.constant 5 : index
    %c0_96 = arith.constant 0 : index
    %175 = vector.load %arg16[%c5_95, %c0_96] : memref<9x256xf32, #tpu.memory_space<vmem>>, vector<1x256xf32>
    %176 = vector.broadcast %175 : vector<1x256xf32> to vector<16x256xf32>
    %177 = arith.mulf %174, %176 : vector<16x256xf32>
    %c241_i32_97 = arith.constant 241 : i32
    %178 = tpu.dynamic_rotate %156 by %c241_i32_97 dim 1 : vector<16x256xf32>, i32 -> vector<16x256xf32>
    %c6_98 = arith.constant 6 : index
    %c0_99 = arith.constant 0 : index
    %179 = vector.load %arg16[%c6_98, %c0_99] : memref<9x256xf32, #tpu.memory_space<vmem>>, vector<1x256xf32>
    %180 = vector.broadcast %179 : vector<1x256xf32> to vector<16x256xf32>
    %181 = arith.mulf %178, %180 : vector<16x256xf32>
    %c240_i32_100 = arith.constant 240 : i32
    %182 = tpu.dynamic_rotate %156 by %c240_i32_100 dim 1 : vector<16x256xf32>, i32 -> vector<16x256xf32>
    %c7_101 = arith.constant 7 : index
    %c0_102 = arith.constant 0 : index
    %183 = vector.load %arg16[%c7_101, %c0_102] : memref<9x256xf32, #tpu.memory_space<vmem>>, vector<1x256xf32>
    %184 = vector.broadcast %183 : vector<1x256xf32> to vector<16x256xf32>
    %185 = arith.mulf %182, %184 : vector<16x256xf32>
    %c239_i32_103 = arith.constant 239 : i32
    %186 = tpu.dynamic_rotate %156 by %c239_i32_103 dim 1 : vector<16x256xf32>, i32 -> vector<16x256xf32>
    %c8_104 = arith.constant 8 : index
    %c0_105 = arith.constant 0 : index
    %187 = vector.load %arg16[%c8_104, %c0_105] : memref<9x256xf32, #tpu.memory_space<vmem>>, vector<1x256xf32>
    %188 = vector.broadcast %187 : vector<1x256xf32> to vector<16x256xf32>
    %189 = arith.mulf %186, %188 : vector<16x256xf32>
    %190 = tpu.concatenate %161, %165, %169, %173, %156, %177, %181, %185, %189 in 0 : vector<16x256xf32>, vector<16x256xf32>, vector<16x256xf32>, vector<16x256xf32>, vector<16x256xf32>, vector<16x256xf32>, vector<16x256xf32>, vector<16x256xf32>, vector<16x256xf32> -> vector<144x256xf32>
    %191 = arith.truncf %190 : vector<144x256xf32> to vector<144x256xbf16>
    %cst_106 = arith.constant dense<0.000000e+00> : vector<16x256xf32>
    %192 = tpu.matmul %157, %191, %cst_106 {dimension_numbers = #tpu.dot_dimension_numbers<[1], [0], [0], [1], [0, 0, 1, 1], [], []>} : vector<16x144xbf16>, vector<144x256xbf16>, vector<16x256xf32> -> vector<16x256xf32>
    %c0_107 = arith.constant 0 : index
    %c0_108 = arith.constant 0 : index
    %193 = vector.load %arg17[%c0_107, %c0_108] : memref<256x64xf32, #tpu.memory_space<vmem>>, vector<256x64xf32>
    %cst_109 = arith.constant dense<0.000000e+00> : vector<16x64xf32>
    %194 = tpu.matmul %192, %193, %cst_109 {dimension_numbers = #tpu.dot_dimension_numbers<[1], [0], [0], [1], [0, 0, 1, 1], [], []>} : vector<16x256xf32>, vector<256x64xf32>, vector<16x64xf32> -> vector<16x64xf32>
    %c0_110 = arith.constant 0 : index
    %c0_111 = arith.constant 0 : index
    %195 = vector.load %arg15[%c0_110, %c0_111] : memref<16x1xf32, #tpu.memory_space<vmem>>, vector<16x1xf32>
    %196 = vector.broadcast %195 : vector<16x1xf32> to vector<16x64xf32>
    %197 = arith.addf %194, %196 : vector<16x64xf32>
    %c0_112 = arith.constant 0 : index
    %c0_113 = arith.constant 0 : index
    %c0_114 = arith.constant 0 : index
    %198 = vector.load %arg18[%c0_112, %c0_113, %c0_114] : memref<1x16x64xf32, #tpu.memory_space<vmem>>, vector<1x16x64xf32>
    %199 = vector.shape_cast %198 : vector<1x16x64xf32> to vector<16x64xf32>
    %200 = vector.shape_cast %197 : vector<16x64xf32> to vector<1x16x64xf32>
    tpu.vector_store %arg18[%c0_112, %c0_113, %c0_114], %200 {strides = array<i32>} : memref<1x16x64xf32, #tpu.memory_space<vmem>>, vector<1x16x64xf32>,
    return
  }
  func.func @transform_0(%arg0: i32) -> (i32, i32, i32) {
    %c0_i32 = arith.constant 0 : i32
    %c0_i32_0 = arith.constant 0 : i32
    %c0_i32_1 = arith.constant 0 : i32
    return %arg0, %c0_i32, %c0_i32_0 : i32, i32, i32
  }
  func.func @transform_1(%arg0: i32) -> (i32, i32) {
    %c0_i32 = arith.constant 0 : i32
    %c0_i32_0 = arith.constant 0 : i32
    %c0_i32_1 = arith.constant 0 : i32
    return %c0_i32, %c0_i32_0 : i32, i32
  }
  func.func @transform_2(%arg0: i32) -> (i32, i32) {
    %c0_i32 = arith.constant 0 : i32
    %c0_i32_0 = arith.constant 0 : i32
    %c0_i32_1 = arith.constant 0 : i32
    return %c0_i32, %c0_i32_0 : i32, i32
  }
  func.func @transform_3(%arg0: i32) -> (i32, i32) {
    %c0_i32 = arith.constant 0 : i32
    %c0_i32_0 = arith.constant 0 : i32
    %c0_i32_1 = arith.constant 0 : i32
    return %c0_i32, %c0_i32_0 : i32, i32
  }
  func.func @transform_4(%arg0: i32) -> (i32, i32) {
    %c0_i32 = arith.constant 0 : i32
    %c0_i32_0 = arith.constant 0 : i32
    %c0_i32_1 = arith.constant 0 : i32
    return %c0_i32, %c0_i32_0 : i32, i32
  }
  func.func @transform_5(%arg0: i32) -> (i32, i32) {
    %c0_i32 = arith.constant 0 : i32
    %c0_i32_0 = arith.constant 0 : i32
    %c0_i32_1 = arith.constant 0 : i32
    return %c0_i32, %c0_i32_0 : i32, i32
  }
  func.func @transform_6(%arg0: i32) -> (i32, i32) {
    %c0_i32 = arith.constant 0 : i32
    %c0_i32_0 = arith.constant 0 : i32
    %c0_i32_1 = arith.constant 0 : i32
    return %c0_i32, %c0_i32_0 : i32, i32
  }
  func.func @transform_7(%arg0: i32) -> (i32, i32) {
    %c0_i32 = arith.constant 0 : i32
    %c0_i32_0 = arith.constant 0 : i32
    %c0_i32_1 = arith.constant 0 : i32
    return %c0_i32, %c0_i32_0 : i32, i32
  }
  func.func @transform_8(%arg0: i32) -> (i32, i32) {
    %c0_i32 = arith.constant 0 : i32
    %c0_i32_0 = arith.constant 0 : i32
    %c0_i32_1 = arith.constant 0 : i32
    return %c0_i32, %c0_i32_0 : i32, i32
  }
  func.func @transform_9(%arg0: i32) -> (i32, i32) {
    %c0_i32 = arith.constant 0 : i32
    %c0_i32_0 = arith.constant 0 : i32
    %c0_i32_1 = arith.constant 0 : i32
    return %c0_i32, %c0_i32_0 : i32, i32
  }
  func.func @transform_10(%arg0: i32) -> (i32, i32) {
    %c0_i32 = arith.constant 0 : i32
    %c0_i32_0 = arith.constant 0 : i32
    %c0_i32_1 = arith.constant 0 : i32
    return %c0_i32, %c0_i32_0 : i32, i32
  }
  func.func @transform_11(%arg0: i32) -> (i32, i32) {
    %c0_i32 = arith.constant 0 : i32
    %c0_i32_0 = arith.constant 0 : i32
    %c0_i32_1 = arith.constant 0 : i32
    return %c0_i32, %c0_i32_0 : i32, i32
  }
  func.func @transform_12(%arg0: i32) -> (i32, i32) {
    %c0_i32 = arith.constant 0 : i32
    %c0_i32_0 = arith.constant 0 : i32
    %c0_i32_1 = arith.constant 0 : i32
    return %c0_i32, %c0_i32_0 : i32, i32
  }
  func.func @transform_13(%arg0: i32) -> (i32, i32) {
    %c0_i32 = arith.constant 0 : i32
    %c0_i32_0 = arith.constant 0 : i32
    %c0_i32_1 = arith.constant 0 : i32
    return %c0_i32, %c0_i32_0 : i32, i32
  }
  func.func @transform_14(%arg0: i32) -> (i32, i32) {
    %c0_i32 = arith.constant 0 : i32
    %c0_i32_0 = arith.constant 0 : i32
    %c0_i32_1 = arith.constant 0 : i32
    return %c0_i32, %c0_i32_0 : i32, i32
  }
  func.func @transform_15(%arg0: i32) -> (i32, i32) {
    %c0_i32 = arith.constant 0 : i32
    %c0_i32_0 = arith.constant 0 : i32
    %c0_i32_1 = arith.constant 0 : i32
    return %c0_i32, %c0_i32_0 : i32, i32
  }
  func.func @transform_16(%arg0: i32) -> (i32, i32) {
    %c0_i32 = arith.constant 0 : i32
    %c0_i32_0 = arith.constant 0 : i32
    %c0_i32_1 = arith.constant 0 : i32
    return %c0_i32, %c0_i32_0 : i32, i32
  }
  func.func @transform_17(%arg0: i32) -> (i32, i32, i32) {
    %c0_i32 = arith.constant 0 : i32
    %c0_i32_0 = arith.constant 0 : i32
    %c0_i32_1 = arith.constant 0 : i32
    return %arg0, %c0_i32, %c0_i32_0 : i32, i32, i32
  }
}

</mosaic_0001>

<bundles_post_ra>
// kernel: down_encoder_block_2d.1
= control target key start
LH: loop header
LB: loop body
LE: loop exit
PB: predicated region body
PF: predicated region fallthrough
CT: control target
= control target key end

     0   :  { %s2095_s24 = smov 0   ;;  %s2910_s0 = inlined_call_operand.vmem [shape: f32[2,8,256], index: 0, kind: input, shape index: {}]   ;;  %s2911_s1 = inlined_call_operand.vmem [shape: f32[8,8], index: 1, kind: input, shape index: {}]   ;;  %s2912_s2 = inlined_call_operand.vmem [shape: f32[8,1], index: 2, kind: input, shape index: {}]   ;;  %s2913_s3 = inlined_call_operand.vmem [shape: f32[8,1], index: 3, kind: input, shape index: {}]   ;;  %s2914_s4 = inlined_call_operand.vmem [shape: bf16[16,72], index: 4, kind: input, shape index: {}]   ;;  %s2915_s5 = inlined_call_operand.vmem [shape: f32[16,1], index: 5, kind: input, shape index: {}]   ;;  %s2916_s6 = inlined_call_operand.vmem [shape: f32[16,16], index: 6, kind: input, shape index: {}]   ;;  %s2917_s7 = inlined_call_operand.vmem [shape: f32[16,1], index: 7, kind: input, shape index: {}]   ;;  %s2918_s8 = inlined_call_operand.vmem [shape: f32[16,1], index: 8, kind: input, shape index: {}]   ;;  %s2919_s9 = inlined_call_operand.vmem [shape: bf16[16,144], index: 9, kind: input, shape index: {}]   ;;  %s2920_s10 = inlined_call_operand.vmem [shape: f32[16,1], index: 10, kind: input, shape index: {}]   ;;  %s2921_s11 = inlined_call_operand.vmem [shape: bf16[16,8], index: 11, kind: input, shape index: {}]   ;;  %s2922_s12 = inlined_call_operand.vmem [shape: f32[16,1], index: 12, kind: input, shape index: {}]   ;;  %s2923_s13 = inlined_call_operand.vmem [shape: bf16[16,144], index: 13, kind: input, shape index: {}]   ;;  %s2924_s14 = inlined_call_operand.vmem [shape: f32[16,1], index: 14, kind: input, shape index: {}]   ;;  %s2925_s15 = inlined_call_operand.vmem [shape: f32[9,256], index: 15, kind: input, shape index: {}]   ;;  %s2926_s16 = inlined_call_operand.vmem [shape: f32[256,64], index: 16, kind: input, shape index: {}]   ;;  %s2927_s17 = inlined_call_operand.vmem [shape: f32[2,16,64], index: 17, kind: output, shape index: {}]  }
   0x1   :  { %2940 = sst [smem:[#allocation2_spill]] %s2910_s0 }
   0x2   :  { %2941 = sst [smem:[#allocation3_spill]] %s2911_s1 }
   0x3 LB: > { %s1852_s25 = sadd.s32 4294967295, %s1992_s24   ;;  %p1856_p0 = scmp.ge.s32.totalorder %s1992_s24, 1  ;;  %s1992_s24 = sphi %s2095_s24, %s27_s24  }
   0x4   : > { %p487_p1 = scmp.lt.s32.totalorder %s1992_s24, 3 }
   0x6   : > { %p488_p2 = pnand %p1856_p0, %p487_p1 }
   0x7   : > { %p539_p3 = scmp.lt.s32.totalorder (!%p488_p2), %s1852_s25, 1  ;;  %s2942_s29 = sld [smem:[#allocation2_spill]] (!%p488_p2) }
   0x8   : > { %491 = sbr.rel (%p488_p2) target bundleno = 1999 (0x7cf), region = 88  ;;  %s2943_s19 = sld [smem:[#allocation3_spill]] (!%p488_p2) }
   0x9   : > { %s1996_s23 = smov (!%p488_p2), 113   ;;  %s2936_s27 = smov (!%p488_p2), 111  }
   0xa   : > { %s1998_s28 = smov (!%p488_p2), 15   ;;  %s2930_s30 = smov (!%p488_p2), 17  }
   0xb   : > { %s2001_s18 = smov (!%p488_p2), 127   ;;  %s2938_s1 = smov (!%p488_p2), 1  }
   0xc   : > { %s2956_s22 = smov (!%p488_p2), 1  }
   0xd   : > { %s2968_s25 = smov (!%p539_p3, %s1852_s25), 1  ;;  %vm2929_vm0 = vcmask 64512   ;;  %v1994_v11 = vmov 512.0   ;;  %v1995_v15 = vmov 0   ;;  %v553_v32 = vld [vmem:[%s2912_s2] sm:$0xff]  ;;  %vm889_vm14 = vcmask 1043456  }
   0xe   : > { %s2928_s26 = sshll.u32 %s2968_s25, 4  ;;  %v552_v0 = vld [vmem:[%s2943_s19] sm:$0xff]  ;;  %1950 = vrcp.f32 %v1994_v11  ;;  %1947 = vset.pattern.permute.xlu1 %v1995_v15  ;;  %1948 = vset.pattern.permute.xlu2 %v1995_v15  ;;  %s2932_s19 = smov 16  }
   0xf   : > { %s2111_s0 = scalar_lea.vmem %s2942_s29, %s2928_s26  ;;  %1949 = vset.pattern.permute.xlu0 %v1995_v15  ;;  %v554_v36 = vld [vmem:[%s2913_s3] sm:$0xff]  ;;  %s1999_s29 = smov 112  }
  0x10   : > { %v551_v1 = vld [vmem:[%s2111_s0 + $0x8] sm:$0xff]  ;;  %v550_v2 = vld [vmem:[%s2111_s0] sm:$0xff] }
  0x11   : > { %594 = vmatpush.msra.mxu2 %v551_v1  ;;  %574 = vmatpush.msra.mxu0 %v550_v2  ;;  %v599_v3 = vmul.f32 %v550_v2, %v550_v2  ;;  %v600_v4 = vmul.f32 %v551_v1, %v551_v1 }
  0x12   : > { %1862 = vmatmul.msk.f32.vlgmr.msra.gmra.mxu2 %vm2929_vm0, %v552_v0  ;;  %1861 = vmatmul.msk.f32.vlgmr.msra.gmra.mxu0 %vm2929_vm0, %v552_v0 }
  0x13   : > { %616 = vmatpush.msrb.mxu2 %v599_v3  ;;  %636 = vmatpush.msrb.mxu0 %v600_v4 }
  0x14   : > { %v1951_v12 = vpop.eup %1950 }
  0x15   : > { %v645_v13 = vmul.f32 512.0, %v1951_v12  ;;  %vm649_vm1 = vweird.f32 %v1951_v12 }
  0x17   : > { %v646_v14 = vsub.f32 1.0, %v645_v13  ;;  %v1873_v13 = vld [vmem:[%s2925_s15 + $0x10] ss:$8 sm:$0x3] }
  0x18   : > { %v2175_v15 = vperm.slane %v1873_v13, 1 }
  0x19   : > { %v647_v16 = vmul.f32 %v1951_v12, %v646_v14  ;;  %v2173_v14 = vperm.slane %v1873_v13, 0  ;;  %v1867_v13 = vld [vmem:[%s2925_s15 + $0x1] ss:$8 sm:$0x3] }
  0x1a   : > { %1863 = vmatmul.msk.f32.vlgmr.msrb.gmra.mxu2 %vm2929_vm0, %v552_v0  ;;  %1864 = vmatmul.msk.f32.vlgmr.msrb.gmra.mxu0 %vm2929_vm0, %v552_v0 }
  0x1b   : > { %v648_v17 = vadd.f32 %v1951_v12, %v647_v16 }
  0x1d   : > { %v650_v19 = vsel %vm649_vm1, %v1951_v12, %v648_v17 }
  0x8f   : > { %v576_v5 = vpop.f32.mrf.mxu0 }
  0x95   : > { %v596_v6 = vpop.f32.mrf.mxu2 }
  0x96   : > { %v641_v7 = vadd.f32 %v596_v6, %v576_v5 }
  0x97   : > { %v638_v8 = vpop.f32.mrf.mxu0 }
  0x98   : > { %642 = vadd.xlane.f32.xlu0 %v641_v7 }
  0x9d   : > { %v618_v9 = vpop.f32.mrf.mxu2 }
  0x9e   : > { %v652_v10 = vadd.f32 %v638_v8, %v618_v9  ;;  %v730_v9 = vld [vmem:[%s2915_s5 + $0x8] sm:$0xff] }
  0xa0   : > { %653 = vadd.xlane.f32.xlu0 %v652_v10  ;;  %v735_v10 = vlaneseq }
  0xa2   : > { %v2167_v12 = vand.u32 127, %v735_v10 }
  0xa4   : > { %vm848_vm13 = vcmp.lt.s32.totalorder %v2167_v12, 111  ;;  %vm816_vm15 = vcmp.lt.s32.totalorder %v2167_v12, 113  ;;  %vm832_vm1 = vcmp.lt.s32.totalorder %v2167_v12, 112 }
 0x10b   : > { %v643_v18 = vpop.xlane.xlu0 %642 }
 0x10c   : > { %v651_v20 = vmul.f32 %v650_v19, %v643_v18 }
 0x10e   : > { %v656_v22 = vmul.f32 %v651_v20, %v651_v20  ;;  %v670_v38 = vsub.f32 %v550_v2, %v651_v20  ;;  %v671_v39 = vsub.f32 %v551_v1, %v651_v20 }
 0x113   : > { %v654_v21 = vpop.xlane.xlu0 %653 }
 0x114   : > { %v655_v23 = vmul.f32 %v654_v21, %v650_v19 }
 0x116   : > { %v657_v24 = vsub.f32 %v655_v23, %v656_v22 }
 0x118   : > { %v658_v25 = vmax.f32 %v657_v24, 0.0 }
 0x11a   : > { %v659_v26 = vadd.f32 1e-06, %v658_v25 }
 0x11c   : > { %1952 = vrsqrt.f32 %v659_v26  ;;  %vm666_vm3 = vweird.f32 %v659_v26 }
 0x122   : > { %v1953_v27 = vpop.eup %1952 }
 0x123   : > { %v661_v28 = vmul.f32 %v1953_v27, %v659_v26  ;;  %vm667_vm2 = vweird.f32 %v1953_v27 }
 0x124   : > { %vm668_vm4 = vmor %vm666_vm3, %vm667_vm2  ;;  %vm800_vm2 = vcmp.lt.s32.totalorder %v2167_v12, 127  ;;  %vm768_vm3 = vcmp.lt.s32.totalorder %v2167_v12, 15 }
 0x125   : > { %v662_v29 = vmul.f32 %v1953_v27, %v661_v28 }
 0x127   : > { %v663_v30 = vmul.f32 0.5, %v662_v29  ;;  %v1871_v29 = vld [vmem:[%s2925_s15 + $0x6] ss:$8 sm:$0x3] }
 0x129   : > { %v664_v31 = vsub.f32 1.5, %v663_v30  ;;  %v1872_v30 = vld [vmem:[%s2925_s15 + $0x7] ss:$8 sm:$0x3] }
 0x12b   : > { %v665_v33 = vmul.f32 %v1953_v27, %v664_v31  ;;  %v2192_v31 = vperm.slane %v1871_v29, 0 }
 0x12d   : > { %v669_v34 = vsel %vm668_vm4, %v1953_v27, %v665_v33  ;;  %v2197_v33 = vperm.slane %v1872_v30, 0  ;;  %vm784_vm4 = vcmp.lt.s32.totalorder %v2167_v12, 1 }
 0x12e   : > { %v672_v35 = vmul.f32 %v669_v34, %v553_v32  ;;  %v2194_v32 = vperm.slane %v1871_v29, 1  ;;  %v2199_v34 = vperm.slane %v1872_v30, 1 }
 0x130   : > { %675 = vperm.xlu1 %1947, %v672_v35  }
 0x138   : > { %682 = vperm.xlu1 %1947, %v554_v36  }
 0x1a2   : > { %v676_v37 = vpop.permute.xlu1 %675 }
 0x1a3   : > { %v678_v40 = vmul.f32 %v676_v37, %v670_v38  ;;  %v679_v41 = vmul.f32 %v676_v37, %v671_v39 }
 0x1aa   : > { %v683_v42 = vpop.permute.xlu1 %682 }
 0x1ab   : > { %v685_v43 = vadd.f32 %v683_v42, %v678_v40  ;;  %v686_v44 = vadd.f32 %v683_v42, %v679_v41  ;;  %v729_v42 = vld [vmem:[%s2915_s5] sm:$0xff] }
 0x1ad   : > { %v1865_v45 = vmul.f32 -1.442695, %v685_v43  ;;  %v1866_v46 = vmul.f32 -1.442695, %v686_v44 }
 0x1af   : > { %1954 = vpow2.f32 %v1865_v45 }
 0x1b0   : > { %1956 = vpow2.f32 %v1866_v46 }
 0x1b5   : > { %v1955_v47 = vpop.eup %1954 }
 0x1b6   : > { %v1957_v48 = vpop.eup %1956  ;;  %v693_v49 = vadd.f32 1.0, %v1955_v47  ;;  %v1870_v47 = vld [vmem:[%s2925_s15 + $0x5] ss:$8 sm:$0x3] }
 0x1b7   : > { %v694_v50 = vadd.f32 1.0, %v1957_v48 }
 0x1b8   : > { %1958 = vrcp.f32 %v693_v49  ;;  %v706_v56 = vand.u32 2147483648, %v693_v49  ;;  %v704_v59 = vand.u32 2147483647, %v693_v49  ;;  %vm700_vm7 = vweird.f32 %v693_v49 }
 0x1b9   : > { %1960 = vrcp.f32 %v694_v50  ;;  %v721_v60 = vand.u32 2147483648, %v694_v50  ;;  %v719_v62 = vand.u32 2147483647, %v694_v50  ;;  %vm715_vm9 = vweird.f32 %v694_v50 }
 0x1ba   : > { %v707_v0 = vor.u32 1.1754944e-38, %v706_v56  ;;  %vm705_vm10 = vcmp.eq.f32.partialorder %v704_v59, 8.507059e+37 }
 0x1bb   : > { %v722_v3 = vor.u32 1.1754944e-38, %v721_v60  ;;  %vm720_vm12 = vcmp.eq.f32.partialorder %v719_v62, 8.507059e+37  ;;  %v1869_v60 = vld [vmem:[%s2925_s15 + $0x3] ss:$8 sm:$0x3] }
 0x1be   : > { %v1959_v51 = vpop.eup %1958 }
 0x1bf   : > { %v1961_v52 = vpop.eup %1960  ;;  %v696_v53 = vmul.f32 %v1959_v51, %v693_v49  ;;  %vm701_vm5 = vweird.f32 %v1959_v51 }
 0x1c0   : > { %v711_v54 = vmul.f32 %v1961_v52, %v694_v50  ;;  %vm716_vm6 = vweird.f32 %v1961_v52  ;;  %vm702_vm8 = vmor %vm700_vm7, %vm701_vm5  ;;  %v2220_v50 = vperm.slane %v1870_v47, 0  ;;  %vm2935_vm5 = vcmp.lt.s32.totalorder %v2167_v12, 16 }
 0x1c1   : > { %v697_v55 = vsub.f32 1.0, %v696_v53  ;;  %vm717_vm11 = vmor %vm715_vm9, %vm716_vm6  ;;  %vm2934_vm6 = vcmp.lt.s32.totalorder %v2167_v12, 17  ;;  %vm885_vm7 = vcmask 588800  }
 0x1c2   : > { %v712_v57 = vsub.f32 1.0, %v711_v54 }
 0x1c3   : > { %v698_v58 = vmul.f32 %v1959_v51, %v697_v55  ;;  %v1868_v55 = vld [vmem:[%s2925_s15 + $0x2] ss:$8 sm:$0x3] }
 0x1c4   : > { %v713_v61 = vmul.f32 %v1961_v52, %v712_v57 }
 0x1c5   : > { %v699_v63 = vadd.f32 %v1959_v51, %v698_v58 }
 0x1c6   : > { %v714_v1 = vadd.f32 %v1961_v52, %v713_v61 }
 0x1c7   : > { %v703_v2 = vsel %vm702_vm8, %v1959_v51, %v699_v63  ;;  %v2222_v51 = vperm.slane %v1870_v47, 1  ;;  %v2239_v63 = vperm.slane %v1868_v55, 0  ;;  %vm930_vm8 = vcmask 130048  }
 0x1c8   : > { %v708_v4 = vsel %vm705_vm10, %v707_v0, %v703_v2  ;;  %v718_v5 = vsel %vm717_vm11, %v1961_v52, %v714_v1  ;;  %v2241_v0 = vperm.slane %v1868_v55, 1  ;;  %v2244_v1 = vperm.slane %v1869_v60, 0 }
 0x1c9   : > { %v723_v6 = vsel %vm720_vm12, %v722_v3, %v718_v5  ;;  %v2128_v7 = vmul.f32 %v708_v4, %v685_v43  ;;  %v2246_v2 = vperm.slane %v1869_v60, 1 }
 0x1ca   : > { %v2130_v8 = vmul.f32 %v723_v6, %v686_v44 }
 0x1cb   : > { %812 = vrot.lane.b32.xlu0 %v2128_v7, %s1996_s23  ;;  %844 = vrot.lane.b32.xlu2 %v2128_v7, %s2936_s27 }
 0x1cc   : > { %814 = vrot.lane.b32.xlu1 %v2130_v8, %s1996_s23 }
 0x1d3   : > { %766 = vrot.lane.b32.xlu0 %v2130_v8, %s1998_s28  ;;  %846 = vrot.lane.b32.xlu2 %v2130_v8, %s2936_s27 }
 0x1d4   : > { %830 = vrot.lane.b32.xlu1 %v2130_v8, %s1999_s29 }
 0x1db   : > { %731 = vrot.lane.b32.xlu0 %v2128_v7, %s2930_s30  ;;  %828 = vrot.lane.b32.xlu2 %v2128_v7, %s1999_s29 }
 0x1dc   : > { %798 = vrot.lane.b32.xlu1 %v2130_v8, %s2001_s18 }
 0x1e3   : > { %750 = vrot.lane.b32.xlu0 %v2130_v8, %s2932_s19  ;;  %796 = vrot.lane.b32.xlu2 %v2128_v7, %s2001_s18 }
 0x1e4   : > { %780 = vrot.lane.b32.xlu1 %v2128_v7, %s2938_s1 }
 0x1eb   : > { %764 = vrot.lane.b32.xlu2 %v2128_v7, %s1998_s28 }
 0x1ec   : > { %733 = vrot.lane.b32.xlu1 %v2130_v8, %s2930_s30  ;;  %s2944_s30 = smov 16  }
 0x1f3   : > { %782 = vrot.lane.b32.xlu2 %v2130_v8, %s2938_s1 }
 0x1f4   : > { %877 = vperm.xlu1 %1947, %v730_v9  }
 0x1fb   : > { %748 = vrot.lane.b32.xlu2 %v2128_v7, %s2932_s19  ;;  %s2945_s19 = smov 17  }
 0x203   : > { %872 = vperm.xlu2 %1948, %v729_v42  }
 0x225   : > { %v845_v11 = vpop.permute.xlu2 %844 }
 0x22d   : > { %v847_v16 = vpop.permute.xlu2 %846 }
 0x22e   : > { %v849_v17 = vsel %vm848_vm13, %v845_v11, %v847_v16  ;;  %v850_v18 = vsel %vm848_vm13, %v847_v16, %v845_v11  ;;  %v740_v16 = vld [vmem:[%s2925_s15] ss:$8 sm:$0x3] }
 0x22f   : > { %v858_v19 = vmul.f32 %v2173_v14, %v849_v17  ;;  %v859_v20 = vmul.f32 %v2175_v15, %v850_v18 }
 0x231   : > { %v868_v21 = vpack.c.bf16 %v858_v19, %v858_v19  ;;  %v869_v22 = vpack.c.bf16 %v859_v20, %v859_v20 }
 0x233   : > { %v891_v23 = vsel %vm889_vm14, %v868_v21, 0  ;;  %v894_v24 = vsel %vm889_vm14, %v869_v22, 0  ;;  %v2267_v21 = vperm.slane %v1867_v13, 0  ;;  %v2269_v22 = vperm.slane %v1867_v13, 1 }
 0x234   : > { %899 = vmatpush.bf16.msra.mxu0 %v891_v23  ;;  %913 = vmatpush.bf16.msra.mxu1 %v894_v24  ;;  %v2272_v23 = vperm.slane %v740_v16, 0  ;;  %v2274_v24 = vperm.slane %v740_v16, 1  ;;  %v928_v16 = vld [vmem:[%s2918_s8] sm:$0xff] }
 0x235   : > { %v829_v25 = vpop.permute.xlu2 %828 }
 0x23d   : > { %v813_v26 = vpop.permute.xlu0 %812  ;;  %v797_v27 = vpop.permute.xlu2 %796 }
 0x23e   : > { %v815_v28 = vpop.permute.xlu1 %814 }
 0x23f   : > { %v817_v35 = vsel %vm816_vm15, %v813_v26, %v815_v28  ;;  %v818_v36 = vsel %vm816_vm15, %v815_v28, %v813_v26 }
 0x240   : > { %v826_v43 = vmul.f32 %v2192_v31, %v817_v35  ;;  %v827_v44 = vmul.f32 %v2194_v32, %v818_v36 }
 0x245   : > { %v767_v37 = vpop.permute.xlu0 %766  ;;  %v765_v39 = vpop.permute.xlu2 %764 }
 0x246   : > { %v831_v38 = vpop.permute.xlu1 %830  ;;  %v769_v3 = vsel %vm768_vm3, %v765_v39, %v767_v37  ;;  %v770_v4 = vsel %vm768_vm3, %v767_v37, %v765_v39 }
 0x247   : > { %v833_v40 = vsel %vm832_vm1, %v829_v25, %v831_v38  ;;  %v834_v41 = vsel %vm832_vm1, %v831_v38, %v829_v25  ;;  %v779_v9 = vmul.f32 %v2241_v0, %v769_v3 }
 0x248   : > { %v842_v45 = vmul.f32 %v2197_v33, %v833_v40  ;;  %v843_v46 = vmul.f32 %v2199_v34, %v834_v41  ;;  %v1922_v40 = vld [vmem:[%s2914_s4] sm:$0xff] }
 0x24a   : > { %v866_v48 = vpack.c.bf16 %v842_v45, %v826_v43  ;;  %v867_v49 = vpack.c.bf16 %v843_v46, %v827_v44 }
 0x24c   : > { %900 = vmatpush.bf16.msra.mxu0 %v866_v48  ;;  %914 = vmatpush.bf16.msra.mxu1 %v867_v49 }
 0x24d   : > { %v732_v58 = vpop.permute.xlu0 %731  ;;  %v783_v59 = vpop.permute.xlu2 %782 }
 0x24e   : > { %v799_v52 = vpop.permute.xlu1 %798 }
 0x24f   : > { %v801_v53 = vsel %vm800_vm2, %v797_v27, %v799_v52  ;;  %v802_v54 = vsel %vm800_vm2, %v799_v52, %v797_v27 }
 0x250   : > { %v810_v56 = vmul.f32 %v2220_v50, %v801_v53  ;;  %v811_v57 = vmul.f32 %v2222_v51, %v802_v54  ;;  %v924_v54 = vld [vmem:[%s2916_s6] sm:$0xff] }
 0x252   : > { %v864_v61 = vpack.c.bf16 %v810_v56, %v2128_v7  ;;  %v865_v62 = vpack.c.bf16 %v811_v57, %v2130_v8  ;;  %v778_v8 = vmul.f32 %v2239_v63, %v770_v4 }
 0x254   : > { %901 = vmatpush.bf16.msra.mxu0 %v864_v61  ;;  %915 = vmatpush.bf16.msra.mxu1 %v865_v62 }
 0x255   : > { %v751_v17 = vpop.permute.xlu0 %750  ;;  %v749_v18 = vpop.permute.xlu2 %748 }
 0x256   : > { %v781_v5 = vpop.permute.xlu1 %780  ;;  %v753_v25 = vsel %vm2935_vm5, %v749_v18, %v751_v17  ;;  %v754_v26 = vsel %vm2935_vm5, %v751_v17, %v749_v18 }
 0x257   : > { %v785_v6 = vsel %vm784_vm4, %v781_v5, %v783_v59  ;;  %v786_v7 = vsel %vm784_vm4, %v783_v59, %v781_v5  ;;  %v762_v30 = vmul.f32 %v2267_v21, %v754_v26  ;;  %v763_v35 = vmul.f32 %v2269_v22, %v753_v25 }
 0x258   : > { %v794_v10 = vmul.f32 %v2244_v1, %v786_v7  ;;  %v795_v11 = vmul.f32 %v2246_v2, %v785_v6 }
 0x25a   : > { %v862_v19 = vpack.c.bf16 %v794_v10, %v778_v8  ;;  %v863_v20 = vpack.c.bf16 %v795_v11, %v779_v9  ;;  %v2004_v11 = vmov 1024.0  }
 0x25b   : > { %1962 = vrcp.f32 %v2004_v11 }
 0x25c   : > { %902 = vmatpush.bf16.msra.mxu0 %v862_v19  ;;  %916 = vmatpush.bf16.msra.mxu1 %v863_v20 }
 0x25d   : > { %v873_v44 = vpop.permute.xlu2 %872 }
 0x25e   : > { %v734_v27 = vpop.permute.xlu1 %733 }
 0x25f   : > { %v738_v28 = vsel %vm2934_vm6, %v732_v58, %v734_v27  ;;  %v739_v29 = vsel %vm2934_vm6, %v734_v27, %v732_v58  ;;  %v925_v58 = vld [vmem:[%s2916_s6 + $0x8] sm:$0xff] }
 0x260   : > { %v746_v36 = vmul.f32 %v2272_v23, %v739_v29  ;;  %v747_v37 = vmul.f32 %v2274_v24, %v738_v28 }
 0x261   : > { %v1963_v13 = vpop.eup %1962 }
 0x262   : > { %v860_v38 = vpack.c.bf16 %v762_v30, %v746_v36  ;;  %v861_v39 = vpack.c.bf16 %v763_v35, %v747_v37  ;;  %v1040_v17 = vmul.f32 1024.0, %v1963_v13  ;;  %vm1044_vm9 = vweird.f32 %v1963_v13 }
 0x264   : > { %903 = vmatpush.bf16.msra.mxu0 %v860_v38  ;;  %917 = vmatpush.bf16.msra.mxu1 %v861_v39  ;;  %v1041_v18 = vsub.f32 1.0, %v1040_v17 }
 0x266   : > { %v878_v43 = vpop.permute.xlu1 %877  ;;  %v1042_v19 = vmul.f32 %v1963_v13, %v1041_v18 }
 0x267   : > { %1878 = vmatmul.msk.bf16.vlgmr.msra.gmra.mxu0 %vm885_vm7, %v1922_v40  ;;  %1879 = vmatmul.msk.bf16.vlgmr.msra.gmra.mxu1 %vm885_vm7, %v1922_v40 }
 0x268   : > { %v1043_v20 = vadd.f32 %v1963_v13, %v1042_v19 }
 0x26a   : > { %v1045_v25 = vsel %vm1044_vm9, %v1963_v13, %v1043_v20 }
 0x2e4   : > { %v905_v41 = vpop.f32.mrf.mxu0  ;;  %v919_v42 = vpop.f32.mrf.mxu1 }
 0x2e5   : > { %v2295_v49 = vadd.f32 %v905_v41, %v873_v44  ;;  %v2297_v52 = vadd.f32 %v919_v42, %v873_v44 }
 0x2e7   : > { %v983_v56 = vmul.f32 %v2295_v49, %v2295_v49  ;;  %v984_v57 = vmul.f32 %v2297_v52, %v2297_v52 }
 0x2ec   : > { %v907_v45 = vpop.f32.mrf.mxu0  ;;  %v921_v46 = vpop.f32.mrf.mxu1 }
 0x2ed   : > { %v2291_v47 = vadd.f32 %v907_v45, %v878_v43  ;;  %v2293_v48 = vadd.f32 %v921_v46, %v878_v43 }
 0x2ef   : > { %v985_v53 = vmul.f32 %v2291_v47, %v2291_v47  ;;  %951 = vmatpush.msra.mxu2 %v2291_v47  ;;  %974 = vmatpush.msra.mxu3 %v2293_v48  ;;  %v986_v55 = vmul.f32 %v2293_v48, %v2293_v48 }
 0x2f1   : > { %952 = vmatpush.msra.mxu2 %v2295_v49  ;;  %975 = vmatpush.msra.mxu3 %v2297_v52 }
 0x2f2   : > { %1880 = vmatmul.msk.f32.vlgmr.msra.gmra.mxu2 %vm930_vm8, %v924_v54  ;;  %1882 = vmatmul.msk.f32.vlgmr.msra.gmra.mxu3 %vm930_vm8, %v924_v54 }
 0x2f3   : > { %1001 = vmatpush.msrb.mxu2 %v985_v53  ;;  %1024 = vmatpush.msrb.mxu3 %v986_v55 }
 0x2f5   : > { %1002 = vmatpush.msrb.mxu2 %v983_v56  ;;  %1025 = vmatpush.msrb.mxu3 %v984_v57 }
 0x2fa   : > { %1881 = vmatmul.msk.f32.gmra.mxu2 %vm930_vm8, %v925_v58  ;;  %1883 = vmatmul.msk.f32.gmra.mxu3 %vm930_vm8, %v925_v58 }
 0x302   : > { %1884 = vmatmul.msk.f32.vlgmr.msrb.gmra.mxu2 %vm930_vm8, %v924_v54  ;;  %1886 = vmatmul.msk.f32.vlgmr.msrb.gmra.mxu3 %vm930_vm8, %v924_v54 }
 0x30a   : > { %1885 = vmatmul.msk.f32.gmra.mxu2 %vm930_vm8, %v925_v58  ;;  %1887 = vmatmul.msk.f32.gmra.mxu3 %vm930_vm8, %v925_v58 }
 0x375   : > { %v954_v59 = vpop.f32.mrf.mxu2  ;;  %v977_v60 = vpop.f32.mrf.mxu3 }
 0x376   : > { %v1033_v61 = vadd.f32 %v977_v60, %v954_v59  ;;  %v926_v59 = vld [vmem:[%s2917_s7] sm:$0xff] }
 0x378   : > { %1034 = vadd.xlane.f32.xlu0 %v1033_v61 }
 0x37d   : > { %v957_v62 = vpop.f32.mrf.mxu2  ;;  %v980_v3 = vpop.f32.mrf.mxu3 }
 0x37e   : > { %v1036_v4 = vadd.f32 %v980_v3, %v957_v62 }
 0x380   : > { %1037 = vadd.xlane.f32.xlu1 %v1036_v4 }
 0x385   : > { %v1004_v5 = vpop.f32.mrf.mxu2  ;;  %v1027_v6 = vpop.f32.mrf.mxu3 }
 0x386   : > { %v1048_v7 = vadd.f32 %v1027_v6, %v1004_v5  ;;  %v927_v6 = vld [vmem:[%s2917_s7 + $0x8] sm:$0xff] }
 0x388   : > { %1049 = vadd.xlane.f32.xlu2 %v1048_v7 }
 0x38d   : > { %v1007_v8 = vpop.f32.mrf.mxu2  ;;  %v1030_v9 = vpop.f32.mrf.mxu3 }
 0x38e   : > { %v1051_v10 = vadd.f32 %v1030_v9, %v1007_v8  ;;  %v929_v8 = vld [vmem:[%s2918_s8 + $0x8] sm:$0xff] }
 0x390   : > { %1052 = vadd.xlane.f32.xlu0 %v1051_v10 }
 0x3a4   : > { %1106 = vperm.xlu0 %1949, %v928_v16  }
 0x3eb   : > { %v1035_v26 = vpop.xlane.xlu0 %1034 }
 0x3ec   : > { %v1046_v27 = vmul.f32 %v1045_v25, %v1035_v26 }
 0x3ee   : > { %v1056_v29 = vmul.f32 %v1046_v27, %v1046_v27  ;;  %v1084_v11 = vsub.f32 %v2295_v49, %v1046_v27  ;;  %v1085_v13 = vsub.f32 %v2297_v52, %v1046_v27 }
 0x3f3   : > { %v1038_v35 = vpop.xlane.xlu1 %1037 }
 0x3f4   : > { %v2328_v37 = vmul.f32 %v1045_v25, %v1038_v35 }
 0x3f6   : > { %v1057_v41 = vmul.f32 %v2328_v37, %v2328_v37 }
 0x3fb   : > { %v1050_v28 = vpop.xlane.xlu2 %1049 }
 0x3fc   : > { %v1054_v30 = vmul.f32 %v1050_v28, %v1045_v25 }
 0x3fe   : > { %v1058_v36 = vsub.f32 %v1054_v30, %v1056_v29 }
 0x400   : > { %v1060_v38 = vmax.f32 %v1058_v36, 0.0 }
 0x402   : > { %v1062_v39 = vadd.f32 1e-06, %v1060_v38 }
 0x403   : > { %v1053_v40 = vpop.xlane.xlu0 %1052 }
 0x404   : > { %1964 = vrsqrt.f32 %v1062_v39  ;;  %v1055_v42 = vmul.f32 %v1053_v40, %v1045_v25  ;;  %vm1070_vm11 = vweird.f32 %v1062_v39 }
 0x406   : > { %v1059_v43 = vsub.f32 %v1055_v42, %v1057_v41 }
 0x408   : > { %v1061_v44 = vmax.f32 %v1059_v43, 0.0 }
 0x40a   : > { %v1965_v45 = vpop.eup %1964  ;;  %v1063_v46 = vadd.f32 1e-06, %v1061_v44 }
 0x40b   : > { %v1065_v53 = vmul.f32 %v1965_v45, %v1062_v39  ;;  %vm1071_vm10 = vweird.f32 %v1965_v45 }
 0x40c   : > { %1966 = vrsqrt.f32 %v1063_v46  ;;  %vm1072_vm12 = vmor %vm1070_vm11, %vm1071_vm10  ;;  %vm1080_vm9 = vweird.f32 %v1063_v46 }
 0x40d   : > { %v1066_v54 = vmul.f32 %v1965_v45, %v1065_v53 }
 0x40f   : > { %v1067_v55 = vmul.f32 0.5, %v1066_v54 }
 0x411   : > { %v1068_v56 = vsub.f32 1.5, %v1067_v55 }
 0x412   : > { %v1967_v57 = vpop.eup %1966 }
 0x413   : > { %v1075_v58 = vmul.f32 %v1967_v57, %v1063_v46  ;;  %v1069_v60 = vmul.f32 %v1965_v45, %v1068_v56  ;;  %vm1081_vm7 = vweird.f32 %v1967_v57  ;;  %v1086_v56 = vsub.f32 %v2291_v47, %v2328_v37 }
 0x414   : > { %vm1082_vm0 = vmor %vm1080_vm9, %vm1081_vm7 }
 0x415   : > { %v1076_v61 = vmul.f32 %v1967_v57, %v1075_v58  ;;  %v1073_v62 = vsel %vm1072_vm12, %v1965_v45, %v1069_v60 }
 0x416   : > { %v1088_v3 = vmul.f32 %v1073_v62, %v926_v59  ;;  %v1107_v17 = vpop.permute.xlu0 %1106  ;;  %v1087_v59 = vsub.f32 %v2293_v48, %v2328_v37 }
 0x417   : > { %v1077_v4 = vmul.f32 0.5, %v1076_v61 }
 0x418   : > { %1092 = vperm.xlu2 %1948, %v1088_v3  }
 0x419   : > { %v1078_v5 = vsub.f32 1.5, %v1077_v4 }
 0x41b   : > { %v1079_v7 = vmul.f32 %v1967_v57, %v1078_v5 }
 0x41d   : > { %v1083_v9 = vsel %vm1082_vm0, %v1967_v57, %v1079_v7 }
 0x41e   : > { %v1089_v10 = vmul.f32 %v1083_v9, %v927_v6 }
 0x420   : > { %1111 = vperm.xlu2 %1948, %v929_v8   ;;  %1097 = vperm.xlu1 %1947, %v1089_v10  }
 0x472   : > { %v1093_v16 = vpop.permute.xlu2 %1092 }
 0x473   : > { %v1100_v18 = vmul.f32 %v1093_v16, %v1084_v11  ;;  %v1101_v19 = vmul.f32 %v1093_v16, %v1085_v13 }
 0x475   : > { %v1114_v20 = vadd.f32 %v1107_v17, %v1100_v18  ;;  %v1115_v25 = vadd.f32 %v1107_v17, %v1101_v19 }
 0x477   : > { %v1888_v26 = vmul.f32 -1.442695, %v1114_v20  ;;  %v1889_v28 = vmul.f32 -1.442695, %v1115_v25 }
 0x479   : > { %1968 = vpow2.f32 %v1888_v26 }
 0x47a   : > { %1970 = vpow2.f32 %v1889_v28  ;;  %v1112_v8 = vpop.permute.xlu2 %1111 }
 0x47f   : > { %v1969_v29 = vpop.eup %1968 }
 0x480   : > { %v1971_v30 = vpop.eup %1970  ;;  %v1130_v35 = vadd.f32 1.0, %v1969_v29 }
 0x481   : > { %v1131_v36 = vadd.f32 1.0, %v1971_v30 }
 0x482   : > { %1972 = vrcp.f32 %v1130_v35  ;;  %v1145_v40 = vand.u32 2147483648, %v1130_v35  ;;  %v1143_v43 = vand.u32 2147483647, %v1130_v35  ;;  %vm1139_vm11 = vweird.f32 %v1130_v35 }
 0x483   : > { %1974 = vrcp.f32 %v1131_v36  ;;  %v1160_v44 = vand.u32 2147483648, %v1131_v36  ;;  %v1158_v46 = vand.u32 2147483647, %v1131_v36  ;;  %vm1154_vm7 = vweird.f32 %v1131_v36 }
 0x484   : > { %v1146_v54 = vor.u32 1.1754944e-38, %v1145_v40  ;;  %vm1144_vm9 = vcmp.eq.f32.partialorder %v1143_v43, 8.507059e+37 }
 0x485   : > { %v1161_v58 = vor.u32 1.1754944e-38, %v1160_v44  ;;  %vm1159_vm5 = vcmp.eq.f32.partialorder %v1158_v46, 8.507059e+37 }
 0x488   : > { %v1973_v38 = vpop.eup %1972 }
 0x489   : > { %v1975_v49 = vpop.eup %1974  ;;  %v1135_v39 = vmul.f32 %v1973_v38, %v1130_v35  ;;  %vm1140_vm0 = vweird.f32 %v1973_v38 }
 0x48a   : > { %v1150_v52 = vmul.f32 %v1975_v49, %v1131_v36  ;;  %vm1155_vm10 = vweird.f32 %v1975_v49  ;;  %vm1141_vm12 = vmor %vm1139_vm11, %vm1140_vm0 }
 0x48b   : > { %v1136_v27 = vsub.f32 1.0, %v1135_v39  ;;  %vm1156_vm6 = vmor %vm1154_vm7, %vm1155_vm10 }
 0x48c   : > { %v1151_v41 = vsub.f32 1.0, %v1150_v52 }
 0x48d   : > { %v1137_v42 = vmul.f32 %v1973_v38, %v1136_v27 }
 0x48e   : > { %v1152_v45 = vmul.f32 %v1975_v49, %v1151_v41 }
 0x48f   : > { %v1138_v53 = vadd.f32 %v1973_v38, %v1137_v42 }
 0x490   : > { %v1153_v55 = vadd.f32 %v1975_v49, %v1152_v45 }
 0x491   : > { %v1142_v57 = vsel %vm1141_vm12, %v1973_v38, %v1138_v53  ;;  %v1200_v53 = vld [vmem:[%s2920_s10] sm:$0xff] }
 0x492   : > { %v1147_v60 = vsel %vm1144_vm9, %v1146_v54, %v1142_v57  ;;  %v1157_v61 = vsel %vm1156_vm6, %v1975_v49, %v1153_v55  ;;  %v1098_v62 = vpop.permute.xlu1 %1097  ;;  %v1431_v54 = vld [vmem:[%s2922_s12 + $0x8] sm:$0xff]  ;;  %v1430_v57 = vld [vmem:[%s2922_s12] sm:$0xff] }
 0x493   : > { %v1162_v3 = vsel %vm1159_vm5, %v1161_v58, %v1157_v61  ;;  %v2347_v4 = vmul.f32 %v1147_v60, %v1114_v20  ;;  %v1102_v5 = vmul.f32 %v1098_v62, %v1086_v56  ;;  %v1103_v6 = vmul.f32 %v1098_v62, %v1087_v59  ;;  %v1201_v55 = vld [vmem:[%s2920_s10 + $0x8] sm:$0xff] }
 0x494   : > { %v2349_v7 = vmul.f32 %v1162_v3, %v1115_v25 }
 0x495   : > { %v1116_v47 = vadd.f32 %v1112_v8, %v1102_v5  ;;  %v1117_v9 = vadd.f32 %v1112_v8, %v1103_v6  ;;  %1266 = vrot.lane.b32.xlu0 %v2347_v4, %s2001_s18  ;;  %1298 = vrot.lane.b32.xlu1 %v2347_v4, %s1999_s29 }
 0x496   : > { %1286 = vrot.lane.b32.xlu2 %v2349_v7, %s1996_s23 }
 0x497   : > { %v1890_v48 = vmul.f32 -1.442695, %v1116_v47  ;;  %v1891_v37 = vmul.f32 -1.442695, %v1117_v9 }
 0x499   : > { %1976 = vpow2.f32 %v1890_v48 }
 0x49a   : > { %1978 = vpow2.f32 %v1891_v37 }
 0x49d   : > { %1318 = vrot.lane.b32.xlu0 %v2349_v7, %s2936_s27  ;;  %1302 = vrot.lane.b32.xlu1 %v2349_v7, %s1999_s29 }
 0x49e   : > { %1314 = vrot.lane.b32.xlu2 %v2347_v4, %s2936_s27 }
 0x49f   : > { %v1977_v10 = vpop.eup %1976 }
 0x4a0   : > { %v1979_v11 = vpop.eup %1978  ;;  %v1132_v13 = vadd.f32 1.0, %v1977_v10 }
 0x4a1   : > { %v1133_v16 = vadd.f32 1.0, %v1979_v11 }
 0x4a2   : > { %1980 = vrcp.f32 %v1132_v13  ;;  %v1175_v26 = vand.u32 2147483648, %v1132_v13  ;;  %v1173_v30 = vand.u32 2147483647, %v1132_v13  ;;  %vm1169_vm6 = vweird.f32 %v1132_v13 }
 0x4a3   : > { %1982 = vrcp.f32 %v1133_v16  ;;  %v1190_v27 = vand.u32 2147483648, %v1133_v16  ;;  %vm1184_vm12 = vweird.f32 %v1133_v16  ;;  %v1188_v40 = vand.u32 2147483647, %v1133_v16 }
 0x4a4   : > { %v1176_v38 = vor.u32 1.1754944e-38, %v1175_v26  ;;  %vm1174_vm10 = vcmp.eq.f32.partialorder %v1173_v30, 8.507059e+37 }
 0x4a5   : > { %1234 = vrot.lane.b32.xlu0 %v2347_v4, %s1998_s28  ;;  %1282 = vrot.lane.b32.xlu1 %v2347_v4, %s1996_s23  ;;  %v1191_v44 = vor.u32 1.1754944e-38, %v1190_v27  ;;  %vm1189_vm9 = vcmp.eq.f32.partialorder %v1188_v40, 8.507059e+37 }
 0x4a6   : > { %1254 = vrot.lane.b32.xlu2 %v2349_v7, %s2938_s1 }
 0x4a8   : > { %v1981_v17 = vpop.eup %1980 }
 0x4a9   : > { %v1983_v18 = vpop.eup %1982  ;;  %v1165_v19 = vmul.f32 %v1981_v17, %v1132_v13  ;;  %vm1170_vm5 = vweird.f32 %v1981_v17 }
 0x4aa   : > { %v1180_v20 = vmul.f32 %v1983_v18, %v1133_v16  ;;  %vm1171_vm0 = vmor %vm1169_vm6, %vm1170_vm5  ;;  %vm1185_vm11 = vweird.f32 %v1983_v18 }
 0x4ab   : > { %v1166_v25 = vsub.f32 1.0, %v1165_v19  ;;  %vm1186_vm7 = vmor %vm1184_vm12, %vm1185_vm11 }
 0x4ac   : > { %v1181_v28 = vsub.f32 1.0, %v1180_v20 }
 0x4ad   : > { %v1167_v29 = vmul.f32 %v1981_v17, %v1166_v25  ;;  %1222 = vrot.lane.b32.xlu0 %v2349_v7, %s2944_s30  ;;  %1270 = vrot.lane.b32.xlu1 %v2349_v7, %s2001_s18 }
 0x4ae   : > { %v1182_v35 = vmul.f32 %v1983_v18, %v1181_v28  ;;  %1218 = vrot.lane.b32.xlu2 %v2347_v4, %s2944_s30 }
 0x4af   : > { %v1168_v36 = vadd.f32 %v1981_v17, %v1167_v29 }
 0x4b0   : > { %v1183_v39 = vadd.f32 %v1983_v18, %v1182_v35 }
 0x4b1   : > { %v1172_v49 = vsel %vm1171_vm0, %v1981_v17, %v1168_v36 }
 0x4b2   : > { %v1177_v52 = vsel %vm1174_vm10, %v1176_v38, %v1172_v49  ;;  %v1187_v42 = vsel %vm1186_vm7, %v1983_v18, %v1183_v39  ;;  %vm2950_vm10 = vcmp.lt.s32.totalorder %v2167_v12, 17 }
 0x4b3   : > { %v2375_v41 = vmul.f32 %v1177_v52, %v1116_v47  ;;  %v1192_v45 = vsel %vm1189_vm9, %v1191_v44, %v1187_v42  ;;  %vm2951_vm11 = vmmov %vm2950_vm10  ;;  %vm2954_vm9 = vcmask 64512  }
 0x4b4   : > { %v2385_v46 = vmul.f32 %v1192_v45, %v1117_v9  ;;  %vm2952_vm12 = vmmov %vm2950_vm10 }
 0x4b5   : > { %1284 = vrot.lane.b32.xlu0 %v2375_v41, %s1996_s23  ;;  %1250 = vrot.lane.b32.xlu1 %v2347_v4, %s2938_s1  ;;  %v1338_v43 = vpack.c.bf16 %v2375_v41, %v2347_v4  ;;  %vm2953_vm7 = vmmov %vm2950_vm10 }
 0x4b6   : > { %1300 = vrot.lane.b32.xlu2 %v2375_v41, %s1999_s29 }
 0x4bd   : > { %1272 = vrot.lane.b32.xlu0 %v2385_v46, %s2001_s18  ;;  %1238 = vrot.lane.b32.xlu1 %v2349_v7, %s1998_s28 }
 0x4be   : > { %1304 = vrot.lane.b32.xlu2 %v2385_v46, %s1999_s29 }
 0x4c5   : > { %1252 = vrot.lane.b32.xlu0 %v2375_v41, %s2938_s1  ;;  %1202 = vrot.lane.b32.xlu1 %v2347_v4, %s2945_s19 }
 0x4c6   : > { %1268 = vrot.lane.b32.xlu2 %v2375_v41, %s2001_s18 }
 0x4cd   : > { %1240 = vrot.lane.b32.xlu0 %v2385_v46, %s1998_s28  ;;  %1288 = vrot.lane.b32.xlu1 %v2385_v46, %s1996_s23 }
 0x4ce   : > { %1320 = vrot.lane.b32.xlu2 %v2385_v46, %s2936_s27 }
 0x4d5   : > { %1204 = vrot.lane.b32.xlu0 %v2375_v41, %s2945_s19  ;;  %1316 = vrot.lane.b32.xlu1 %v2375_v41, %s2936_s27 }
 0x4d6   : > { %1236 = vrot.lane.b32.xlu2 %v2375_v41, %s1998_s28 }
 0x4dd   : > { %1350 = vperm.xlu0 %1949, %v1200_v53   ;;  %1256 = vrot.lane.b32.xlu1 %v2385_v46, %s2938_s1 }
 0x4de   : > { %1224 = vrot.lane.b32.xlu2 %v2385_v46, %s2944_s30 }
 0x4e5   : > { %1439 = vperm.xlu0 %1949, %v1431_v54   ;;  %1220 = vrot.lane.b32.xlu1 %v2375_v41, %s2944_s30 }
 0x4e6   : > { %1206 = vrot.lane.b32.xlu2 %v2349_v7, %s2945_s19 }
 0x4ed   : > { %1208 = vrot.lane.b32.xlu1 %v2385_v46, %s2945_s19 }
 0x4ee   : > { %1355 = vperm.xlu2 %1948, %v1201_v55  }
 0x4f0   : > { %v1287_v56 = vpop.permute.xlu2 %1286 }
 0x4f5   : > { %1434 = vperm.xlu1 %1947, %v1430_v57  }
 0x4f8   : > { %v1315_v58 = vpop.permute.xlu2 %1314 }
 0x500   : > { %v2433_v59 = vpop.permute.xlu2 %1254 }
 0x507   : > { %v1267_v60 = vpop.permute.xlu0 %1266  ;;  %v1299_v61 = vpop.permute.xlu1 %1298 }
 0x508   : > { %v2435_v62 = vpop.permute.xlu2 %1218 }
 0x50f   : > { %v1303_v3 = vpop.permute.xlu1 %1302  ;;  %v1319_v6 = vpop.permute.xlu0 %1318 }
 0x510   : > { %v1301_v5 = vpop.permute.xlu2 %1300  ;;  %v1306_v8 = vsel %vm832_vm1, %v1299_v61, %v1303_v3  ;;  %v1308_v47 = vsel %vm832_vm1, %v1303_v3, %v1299_v61 }
 0x511   : > { %v1310_v11 = vmul.f32 %v1306_v8, %v2197_v33  ;;  %v1311_v13 = vmul.f32 %v1308_v47, %v2199_v34 }
 0x517   : > { %v1283_v9 = vpop.permute.xlu1 %1282  ;;  %v2449_v18 = vpop.permute.xlu0 %1234 }
 0x518   : > { %v1305_v48 = vpop.permute.xlu2 %1304  ;;  %v1290_v39 = vsel %vm816_vm15, %v1283_v9, %v1287_v56  ;;  %v1292_v52 = vsel %vm816_vm15, %v1287_v56, %v1283_v9 }
 0x519   : > { %v1307_v37 = vsel %vm832_vm1, %v1301_v5, %v1305_v48  ;;  %v1309_v10 = vsel %vm832_vm1, %v1305_v48, %v1301_v5  ;;  %v1294_v53 = vmul.f32 %v1290_v39, %v2192_v31  ;;  %v1295_v54 = vmul.f32 %v1292_v52, %v2194_v32 }
 0x51a   : > { %v1312_v16 = vmul.f32 %v1307_v37, %v2197_v33  ;;  %v1313_v17 = vmul.f32 %v1309_v10, %v2199_v34  ;;  %v1324_v10 = vsel %vm848_vm13, %v1319_v6, %v1315_v58 }
 0x51c   : > { %v1344_v19 = vpack.c.bf16 %v1312_v16, %v1310_v11  ;;  %v1345_v20 = vpack.c.bf16 %v1313_v17, %v1311_v13 }
 0x51e   : > { %1370 = vmatpush.bf16.msrb.mxu0 %v1344_v19  ;;  %1398 = vmatpush.bf16.msra.mxu2 %v1345_v20 }
 0x51f   : > { %v1271_v25 = vpop.permute.xlu1 %1270  ;;  %v2451_v26 = vpop.permute.xlu0 %1222 }
 0x520   : > { %v1269_v35 = vpop.permute.xlu2 %1268  ;;  %v1274_v55 = vsel %vm800_vm2, %v1267_v60, %v1271_v25  ;;  %v1276_v56 = vsel %vm800_vm2, %v1271_v25, %v1267_v60  ;;  %v1322_v60 = vsel %vm848_vm13, %v1315_v58, %v1319_v6  ;;  %v1984_v25 = vld [vmem:[%s2111_s0] sm:$0xff]  ;;  %v1327_v58 = vmul.f32 %v1324_v10, %v2175_v15 }
 0x521   : > { %v1278_v48 = vmul.f32 %v1274_v55, %v2220_v50  ;;  %v1279_v37 = vmul.f32 %v1276_v56, %v2222_v51  ;;  %v1326_v39 = vmul.f32 %v1322_v60, %v2173_v14 }
 0x527   : > { %v1251_v28 = vpop.permute.xlu1 %1250  ;;  %v1285_v29 = vpop.permute.xlu0 %1284 }
 0x528   : > { %v1321_v49 = vpop.permute.xlu2 %1320  ;;  %v1258_v56 = vsel %vm784_vm4, %v1251_v28, %v2433_v59 }
 0x529   : > { %v1263_v41 = vmul.f32 %v1258_v56, %v2246_v2 }
 0x52f   : > { %v2453_v30 = vpop.permute.xlu1 %1238  ;;  %v1273_v38 = vpop.permute.xlu0 %1272 }
 0x530   : > { %v1275_v40 = vsel %vm800_vm2, %v1269_v35, %v1273_v38  ;;  %v1277_v42 = vsel %vm800_vm2, %v1273_v38, %v1269_v35  ;;  %v1237_v11 = vpop.permute.xlu2 %1236  ;;  %v1985_v35 = vld [vmem:[%s2111_s0 + $0x8] sm:$0xff]  ;;  %s2957_s0 = smov 111  }
 0x531   : > { %v1280_v5 = vmul.f32 %v1275_v40, %v2220_v50  ;;  %v1281_v8 = vmul.f32 %v1277_v42, %v2222_v51  ;;  %v1429_v38 = vpack.c.bf16 %v1985_v35, %v1985_v35 }
 0x533   : > { %v1340_v16 = vpack.c.bf16 %v1280_v5, %v1278_v48  ;;  %v1341_v17 = vpack.c.bf16 %v1281_v8, %v1279_v37  ;;  %v1454_v55 = vsel %vm889_vm14, %v1429_v38, 0 }
 0x537   : > { %v2455_v36 = vpop.permute.xlu1 %1202  ;;  %v1253_v57 = vpop.permute.xlu0 %1252 }
 0x53f   : > { %v1289_v27 = vpop.permute.xlu1 %1288 }
 0x540   : > { %v1291_v44 = vsel %vm816_vm15, %v1285_v29, %v1289_v27  ;;  %v1293_v45 = vsel %vm816_vm15, %v1289_v27, %v1285_v29  ;;  %v1428_v29 = vpack.c.bf16 %v1984_v25, %v1984_v25  ;;  %v1923_v27 = vld [vmem:[%s2919_s9 + $0x4] sm:$0xf] }
 0x541   : > { %v1296_v61 = vmul.f32 %v1291_v44, %v2192_v31  ;;  %v1297_v3 = vmul.f32 %v1293_v45, %v2194_v32  ;;  %v1241_v44 = vpop.permute.xlu0 %1240  ;;  %v1339_v45 = vpack.c.bf16 %v2385_v46, %v2349_v7 }
 0x542   : > { %v1243_v7 = vsel %vm768_vm3, %v1237_v11, %v1241_v44 }
 0x543   : > { %v1342_v47 = vpack.c.bf16 %v1296_v61, %v1294_v53  ;;  %v1343_v9 = vpack.c.bf16 %v1297_v3, %v1295_v54  ;;  %v1451_v54 = vsel %vm889_vm14, %v1428_v29, 0  ;;  %v1260_v61 = vsel %vm784_vm4, %v2433_v59, %v1251_v28 }
 0x544   : > { %v1245_v3 = vsel %vm768_vm3, %v1241_v44, %v1237_v11  ;;  %v1262_v4 = vmul.f32 %v1260_v61, %v2244_v1  ;;  %v1249_v48 = vmul.f32 %v1243_v7, %v2241_v0  ;;  %vm2946_vm14 = vcmp.lt.s32.totalorder %v2167_v12, 16  ;;  %v1926_v12 = vld [vmem:[%s2923_s13 + $0x4] sm:$0xf] }
 0x545   : > { %1371 = vmatpush.bf16.msrb.mxu0 %v1342_v47  ;;  %1399 = vmatpush.bf16.msra.mxu2 %v1343_v9  ;;  %v1242_v47 = vsel %vm768_vm3, %v2449_v18, %v2453_v30  ;;  %v1248_v9 = vmul.f32 %v1245_v3, %v2239_v63  ;;  %v1228_v10 = vsel %vm2946_vm14, %v2451_v26, %v2435_v62  ;;  %vm2947_vm5 = vmmov %vm2946_vm14 }
 0x546   : > { %vm2948_vm6 = vmmov %vm2947_vm5 }
 0x547   : > { %v1317_v13 = vpop.permute.xlu1 %1316  ;;  %vm2949_vm0 = vmmov %vm2947_vm5 }
 0x548   : > { %v1323_v19 = vsel %vm848_vm13, %v1317_v13, %v1321_v49  ;;  %v1325_v20 = vsel %vm848_vm13, %v1321_v49, %v1317_v13  ;;  %v1896_v49 = vld [vmem:[%s2919_s9 + $0x8] sm:$0xf0]  ;;  %v1247_v13 = vmul.f32 %v1242_v47, %v2241_v0  ;;  %vm2955_vm14 = vmmov %vm2954_vm9 }
 0x549   : > { %v1328_v6 = vmul.f32 %v1323_v19, %v2173_v14  ;;  %v1329_v52 = vmul.f32 %v1325_v20, %v2175_v15  ;;  %1372 = vmatpush.bf16.msrb.mxu0 %v1340_v16  ;;  %1400 = vmatpush.bf16.msra.mxu2 %v1341_v17  ;;  %v1899_v53 = vor.u32 %v1923_v27, %v1896_v49  ;;  %v1205_v27 = vpop.permute.xlu0 %1204 }
 0x54a   : > { %v1335_v17 = vpack.c.bf16 %v1249_v48, %v1247_v13  ;;  %v1230_v19 = vmul.f32 %v1228_v10, %v2267_v21 }
 0x54b   : > { %v1347_v40 = vpack.c.bf16 %v1329_v52, %v1327_v58  ;;  %v1346_v42 = vpack.c.bf16 %v1328_v6, %v1326_v39  ;;  %v1925_v58 = vld [vmem:[%s2921_s11] sm:$0xff] }
 0x54d   : > { %1391 = vmatpush.bf16.msrb.mxu1 %v1346_v42  ;;  %1419 = vmatpush.bf16.msra.mxu3 %v1347_v40 }
 0x54e   : > { %1373 = vmatpush.bf16.msrb.mxu0 %v1338_v43  ;;  %1401 = vmatpush.bf16.msra.mxu2 %v1339_v45  ;;  %v1225_v43 = vpop.permute.xlu2 %1224 }
 0x54f   : > { %v1257_v46 = vpop.permute.xlu1 %1256 }
 0x550   : > { %v1259_v5 = vsel %vm784_vm4, %v1253_v57, %v1257_v46  ;;  %v1261_v59 = vsel %vm784_vm4, %v1257_v46, %v1253_v57  ;;  %1900 = vmatmul.msk.bf16.vlgmr.msrb.gmra.mxu1 %vm930_vm8, %v1899_v53  ;;  %1901 = vmatmul.msk.bf16.vlgmr.msra.gmra.mxu3 %vm930_vm8, %v1899_v53  ;;  %v1244_v57 = vsel %vm768_vm3, %v2453_v30, %v2449_v18 }
 0x551   : > { %1463 = vmatpush.bf16.msra.mxu1 %v1451_v54  ;;  %1477 = vmatpush.bf16.msrb.mxu3 %v1454_v55  ;;  %v1264_v28 = vmul.f32 %v1261_v59, %v2244_v1  ;;  %v1265_v8 = vmul.f32 %v1259_v5, %v2246_v2  ;;  %v1246_v11 = vmul.f32 %v1244_v57, %v2239_v63  ;;  %v1894_v54 = vld [vmem:[%s2919_s9] sm:$0xf]  ;;  %v1924_v55 = vld [vmem:[%s2919_s9 + $0x4] sm:$0xf0] }
 0x552   : > { %v1226_v18 = vsel %vm2947_vm5, %v2435_v62, %v2451_v26  ;;  %v1895_v7 = vor.u32 %v1924_v55, %v1894_v54 }
 0x553   : > { %v1336_v37 = vpack.c.bf16 %v1264_v28, %v1262_v4  ;;  %v1337_v60 = vpack.c.bf16 %v1265_v8, %v1263_v41  ;;  %v1334_v16 = vpack.c.bf16 %v1248_v9, %v1246_v11  ;;  %v1231_v29 = vmul.f32 %v1226_v18, %v2269_v22  ;;  %v1351_v4 = vpop.permute.xlu0 %1350 }
 0x555   : > { %1374 = vmatpush.bf16.msrb.mxu0 %v1336_v37  ;;  %1402 = vmatpush.bf16.msra.mxu2 %v1337_v60 }
 0x556   : > { %v1207_v62 = vpop.permute.xlu2 %1206 }
 0x557   : > { %v1221_v30 = vpop.permute.xlu1 %1220  ;;  %v1210_v6 = vsel %vm2950_vm10, %v2455_v36, %v1207_v62  ;;  %v1212_v52 = vsel %vm2951_vm11, %v1207_v62, %v2455_v36 }
 0x558   : > { %v1227_v20 = vsel %vm2948_vm6, %v1221_v30, %v1225_v43  ;;  %v1229_v25 = vsel %vm2949_vm0, %v1225_v43, %v1221_v30  ;;  %v1214_v44 = vmul.f32 %v1212_v52, %v2272_v23  ;;  %v1215_v45 = vmul.f32 %v1210_v6, %v2274_v24  ;;  %v1736_v52 = vld [vmem:[%s2924_s14] sm:$0xff] }
 0x559   : > { %v1232_v35 = vmul.f32 %v1229_v25, %v2267_v21  ;;  %v1233_v38 = vmul.f32 %v1227_v20, %v2269_v22  ;;  %1375 = vmatpush.bf16.msrb.mxu0 %v1334_v16  ;;  %1403 = vmatpush.bf16.msra.mxu2 %v1335_v17 }
 0x55b   : > { %v1332_v26 = vpack.c.bf16 %v1232_v35, %v1230_v19  ;;  %v1333_v39 = vpack.c.bf16 %v1233_v38, %v1231_v29  ;;  %v1440_v11 = vpop.permute.xlu0 %1439 }
 0x55d   : > { %1376 = vmatpush.bf16.msrb.mxu0 %v1332_v26  ;;  %1404 = vmatpush.bf16.msra.mxu2 %v1333_v39 }
 0x55e   : > { %v1356_v48 = vpop.permute.xlu2 %1355 }
 0x55f   : > { %v1209_v49 = vpop.permute.xlu1 %1208 }
 0x560   : > { %v1211_v40 = vsel %vm2952_vm12, %v1205_v27, %v1209_v49  ;;  %v1213_v42 = vsel %vm2953_vm7, %v1209_v49, %v1205_v27  ;;  %1906 = vmatmul.msk.bf16.vlgmr.msra.gmra.mxu1 %vm2954_vm9, %v1925_v58  ;;  %1907 = vmatmul.msk.bf16.vlgmr.msrb.gmra.mxu3 %vm2955_vm14, %v1925_v58  ;;  %v1737_v27 = vld [vmem:[%s2924_s14 + $0x8] sm:$0xff] }
 0x561   : > { %v1216_v53 = vmul.f32 %v1213_v42, %v2272_v23  ;;  %v1217_v36 = vmul.f32 %v1211_v40, %v2274_v24 }
 0x563   : > { %v1330_v56 = vpack.c.bf16 %v1216_v53, %v1214_v44  ;;  %v1331_v61 = vpack.c.bf16 %v1217_v36, %v1215_v45 }
 0x565   : > { %1377 = vmatpush.bf16.msrb.mxu0 %v1330_v56  ;;  %1405 = vmatpush.bf16.msra.mxu2 %v1331_v61 }
 0x567   : > { %v1435_v28 = vpop.permute.xlu1 %1434 }
 0x568   : > { %1378 = vmatmul.bf16.vlgmr.msrb.gmra.mxu0 %v1895_v7  ;;  %1406 = vmatmul.bf16.vlgmr.msra.gmra.mxu2 %v1895_v7 }
 0x5cd   : > { %v1393_v46 = vpop.f32.mrf.mxu1 }
 0x5d3   : > { %v1421_v5 = vpop.f32.mrf.mxu3 }
 0x5d5   : > { %v1395_v3 = vpop.f32.mrf.mxu1 }
 0x5db   : > { %v1423_v9 = vpop.f32.mrf.mxu3 }
 0x5dd   : > { %v1465_v59 = vpop.f32.mrf.mxu1 }
 0x5de   : > { %v1466_v8 = vadd.f32 %v1465_v59, %v1435_v28 }
 0x5e3   : > { %v1479_v20 = vpop.f32.mrf.mxu3 }
 0x5e4   : > { %v1480_v29 = vadd.f32 %v1479_v20, %v1435_v28 }
 0x5e5   : > { %v1379_v41 = vpop.f32.mrf.mxu0  ;;  %v1467_v37 = vpop.f32.mrf.mxu1 }
 0x5e6   : > { %v1380_v43 = vadd.f32 %v1379_v41, %v1351_v4  ;;  %v1468_v18 = vadd.f32 %v1467_v37, %v1440_v11 }
 0x5e8   : > { %v1394_v47 = vadd.f32 %v1393_v46, %v1380_v43 }
 0x5ea   : > { %v2581_v57 = vadd.f32 %v1466_v8, %v1394_v47 }
 0x5eb   : > { %v1407_v13 = vpop.f32.mrf.mxu2  ;;  %v1481_v26 = vpop.f32.mrf.mxu3 }
 0x5ec   : > { %1554 = vrot.lane.b32.xlu0 %v2581_v57, %s2001_s18  ;;  %1570 = vrot.lane.b32.xlu1 %v2581_v57, %s1996_s23  ;;  %v1408_v16 = vadd.f32 %v1407_v13, %v1351_v4  ;;  %v1482_v58 = vadd.f32 %v1481_v26, %v1440_v11 }
 0x5ed   : > { %1586 = vrot.lane.b32.xlu2 %v2581_v57, %s1999_s29  ;;  %v1381_v60 = vpop.f32.mrf.mxu0 }
 0x5ee   : > { %v1382_v10 = vadd.f32 %v1381_v60, %v1356_v48  ;;  %v1422_v25 = vadd.f32 %v1421_v5, %v1408_v16 }
 0x5f0   : > { %v1396_v30 = vadd.f32 %v1395_v3, %v1382_v10  ;;  %v2599_v35 = vadd.f32 %v1480_v29, %v1422_v25 }
 0x5f2   : > { %v2589_v17 = vadd.f32 %v1468_v18, %v1396_v30 }
 0x5f3   : > { %v1409_v38 = vpop.f32.mrf.mxu2 }
 0x5f4   : > { %1506 = vrot.lane.b32.xlu0 %v2581_v57, %s2944_s30  ;;  %1522 = vrot.lane.b32.xlu1 %v2581_v57, %s1998_s28  ;;  %v1626_v19 = vpack.c.bf16 %v2589_v17, %v2581_v57  ;;  %v1410_v62 = vadd.f32 %v1409_v38, %v1356_v48 }
 0x5f5   : > { %1538 = vrot.lane.b32.xlu2 %v2581_v57, %s2956_s22 }
 0x5f6   : > { %v1424_v39 = vadd.f32 %v1423_v9, %v1410_v62 }
 0x5f8   : > { %v2625_v6 = vadd.f32 %v1482_v58, %v1424_v39 }
 0x5fc   : > { %1590 = vrot.lane.b32.xlu0 %v2599_v35, %s1999_s29  ;;  %1558 = vrot.lane.b32.xlu1 %v2599_v35, %s2001_s18 }
 0x5fd   : > { %1574 = vrot.lane.b32.xlu2 %v2599_v35, %s1996_s23 }
 0x604   : > { %1542 = vrot.lane.b32.xlu0 %v2599_v35, %s2956_s22  ;;  %1510 = vrot.lane.b32.xlu1 %v2599_v35, %s2944_s30 }
 0x605   : > { %1526 = vrot.lane.b32.xlu2 %v2599_v35, %s1998_s28 }
 0x60c   : > { %1572 = vrot.lane.b32.xlu0 %v2589_v17, %s1996_s23  ;;  %1588 = vrot.lane.b32.xlu1 %v2589_v17, %s1999_s29 }
 0x60d   : > { %1556 = vrot.lane.b32.xlu2 %v2589_v17, %s2001_s18 }
 0x614   : > { %1524 = vrot.lane.b32.xlu0 %v2589_v17, %s1998_s28  ;;  %1540 = vrot.lane.b32.xlu1 %v2589_v17, %s2956_s22 }
 0x615   : > { %1508 = vrot.lane.b32.xlu2 %v2589_v17, %s2944_s30 }
 0x61c   : > { %1560 = vrot.lane.b32.xlu0 %v2625_v6, %s2001_s18  ;;  %1492 = vrot.lane.b32.xlu1 %v2589_v17, %s2945_s19 }
 0x61d   : > { %1592 = vrot.lane.b32.xlu2 %v2625_v6, %s1999_s29 }
 0x624   : > { %1494 = vrot.lane.b32.xlu0 %v2599_v35, %s2945_s19  ;;  %1576 = vrot.lane.b32.xlu1 %v2625_v6, %s1996_s23 }
 0x625   : > { %1490 = vrot.lane.b32.xlu2 %v2581_v57, %s2945_s19 }
 0x62c   : > { %1512 = vrot.lane.b32.xlu0 %v2625_v6, %s2944_s30  ;;  %1602 = vrot.lane.b32.xlu1 %v2581_v57, %s2957_s0 }
 0x62d   : > { %1544 = vrot.lane.b32.xlu2 %v2625_v6, %s2956_s22  ;;  %s2966_s22 = sshll.u32 %s2968_s25, 4 }
 0x62e   : > { %s548_s29 = scalar_lea.vmem %s2927_s17, %s2966_s22 }
 0x634   : > { %1604 = vrot.lane.b32.xlu0 %v2589_v17, %s2957_s0  ;;  %1528 = vrot.lane.b32.xlu1 %v2625_v6, %s1998_s28 }
 0x635   : > { %1496 = vrot.lane.b32.xlu2 %v2625_v6, %s2945_s19 }
 0x63c   : > { %1740 = vperm.xlu0 %1949, %v1736_v52   ;;  %1608 = vrot.lane.b32.xlu1 %v2625_v6, %s2957_s0 }
 0x63d   : > { %1606 = vrot.lane.b32.xlu2 %v2599_v35, %s2957_s0 }
 0x645   : > { %1745 = vperm.xlu2 %1948, %v1737_v27  }
 0x647   : > { %v1587_v49 = vpop.permute.xlu2 %1586 }
 0x64f   : > { %v2661_v40 = vpop.permute.xlu2 %1538 }
 0x657   : > { %v1575_v42 = vpop.permute.xlu2 %1574 }
 0x65e   : > { %v1555_v44 = vpop.permute.xlu0 %1554  ;;  %v1571_v45 = vpop.permute.xlu1 %1570 }
 0x65f   : > { %v1527_v53 = vpop.permute.xlu2 %1526  ;;  %v1578_v29 = vsel %vm816_vm15, %v1571_v45, %v1575_v42  ;;  %v1580_v38 = vsel %vm816_vm15, %v1575_v42, %v1571_v45 }
 0x660   : > { %v1583_v58 = vmul.f32 %v1580_v38, %v2194_v32 }
 0x666   : > { %v2663_v36 = vpop.permute.xlu0 %1506  ;;  %v1523_v54 = vpop.permute.xlu1 %1522 }
 0x667   : > { %v2667_v55 = vsel %vm768_vm3, %v1523_v54, %v1527_v53  ;;  %v2671_v56 = vsel %vm768_vm3, %v1527_v53, %v1523_v54  ;;  %v1557_v61 = vpop.permute.xlu2 %1556 }
 0x66e   : > { %v1591_v7 = vpop.permute.xlu0 %1590  ;;  %v1559_v46 = vpop.permute.xlu1 %1558 }
 0x66f   : > { %v2673_v3 = vpop.permute.xlu2 %1508  ;;  %v1594_v4 = vsel %vm832_vm1, %v1587_v49, %v1591_v7  ;;  %v1596_v41 = vsel %vm832_vm1, %v1591_v7, %v1587_v49  ;;  %v1562_v45 = vsel %vm800_vm2, %v1555_v44, %v1559_v46  ;;  %v1564_v53 = vsel %vm800_vm2, %v1559_v46, %v1555_v44 }
 0x670   : > { %v1598_v48 = vmul.f32 %v1594_v4, %v2197_v33  ;;  %v1599_v37 = vmul.f32 %v1596_v41, %v2199_v34 }
 0x676   : > { %v1543_v5 = vpop.permute.xlu0 %1542  ;;  %v2675_v59 = vpop.permute.xlu1 %1510 }
 0x677   : > { %v1593_v43 = vpop.permute.xlu2 %1592  ;;  %v1548_v46 = vsel %vm784_vm4, %v1543_v5, %v2661_v40 }
 0x67e   : > { %v1573_v28 = vpop.permute.xlu0 %1572  ;;  %v1589_v8 = vpop.permute.xlu1 %1588 }
 0x67f   : > { %v1595_v47 = vsel %vm832_vm1, %v1589_v8, %v1593_v43  ;;  %v1597_v9 = vsel %vm832_vm1, %v1593_v43, %v1589_v8  ;;  %v2689_v16 = vpop.permute.xlu2 %1490  ;;  %vm2959_vm1 = vmmov %vm2949_vm0 }
 0x680   : > { %v1600_v60 = vmul.f32 %v1595_v47, %v2197_v33  ;;  %v1601_v10 = vmul.f32 %v1597_v9, %v2199_v34  ;;  %v1582_v34 = vmul.f32 %v1578_v29, %v2192_v31 }
 0x682   : > { %v1632_v11 = vpack.c.bf16 %v1600_v60, %v1598_v48  ;;  %v1633_v13 = vpack.c.bf16 %v1601_v10, %v1599_v37  ;;  %v1627_v37 = vpack.c.bf16 %v2625_v6, %v2599_v35  ;;  %v1550_v60 = vmul.f32 %v1548_v46, %v2244_v1  ;;  %v1733_v46 = vld [vmem:[%s2926_s16 + $0xe8] sm:$0xff] }
 0x684   : > { %1648 = vmatpush.bf16.msra.mxu0 %v1632_v11  ;;  %1676 = vmatpush.bf16.msrb.mxu2 %v1633_v13 }
 0x686   : > { %v1525_v18 = vpop.permute.xlu0 %1524  ;;  %v1541_v30 = vpop.permute.xlu1 %1540 }
 0x687   : > { %v1545_v52 = vpop.permute.xlu2 %1544 }
 0x688   : > { %v1549_v8 = vsel %vm784_vm4, %v1545_v52, %v1541_v30  ;;  %v1547_v44 = vsel %vm784_vm4, %v1541_v30, %v1545_v52 }
 0x689   : > { %v1553_v48 = vmul.f32 %v1547_v44, %v2246_v2  ;;  %v1717_v44 = vld [vmem:[%s2926_s16 + $0x68] sm:$0xff] }
 0x68e   : > { %v2691_v20 = vpop.permute.xlu1 %1492  ;;  %v1561_v25 = vpop.permute.xlu0 %1560 }
 0x68f   : > { %v1563_v62 = vsel %vm800_vm2, %v1557_v61, %v1561_v25  ;;  %v1565_v27 = vsel %vm800_vm2, %v1561_v25, %v1557_v61  ;;  %v1497_v9 = vpop.permute.xlu2 %1496  ;;  %vm2960_vm2 = vmmov %vm2949_vm0 }
 0x690   : > { %v1568_v54 = vmul.f32 %v1563_v62, %v2220_v50  ;;  %v1569_v43 = vmul.f32 %v1565_v27, %v2222_v51 }
 0x696   : > { %v1577_v33 = vpop.permute.xlu1 %1576  ;;  %v1495_v7 = vpop.permute.xlu0 %1494 }
 0x697   : > { %v1579_v26 = vsel %vm816_vm15, %v1573_v28, %v1577_v33  ;;  %v1581_v39 = vsel %vm816_vm15, %v1577_v33, %v1573_v28  ;;  %v1566_v28 = vmul.f32 %v1562_v45, %v2220_v50  ;;  %v1546_v50 = vsel %vm784_vm4, %v2661_v40, %v1543_v5  ;;  %vm2958_vm15 = vmmov %vm2949_vm0 }
 0x698   : > { %v1584_v49 = vmul.f32 %v1579_v26, %v2192_v31  ;;  %v1585_v42 = vmul.f32 %v1581_v39, %v2194_v32  ;;  %v1567_v31 = vmul.f32 %v1564_v53, %v2222_v51  ;;  %v1552_v51 = vmul.f32 %v1549_v8, %v2244_v1  ;;  %vm2962_vm4 = vmmov %vm2953_vm7  ;;  %v1735_v8 = vld [vmem:[%s2926_s16 + $0xf8] sm:$0xff] }
 0x699   : > { %v1628_v61 = vpack.c.bf16 %v1568_v54, %v1566_v28  ;;  %v1551_v11 = vmul.f32 %v1546_v50, %v2246_v2  ;;  %v1534_v40 = vmul.f32 %v2671_v56, %v2239_v63  ;;  %v1535_v2 = vmul.f32 %v2667_v55, %v2241_v0  ;;  %vm2963_vm5 = vmmov %vm2962_vm4  ;;  %v1716_v50 = vld [vmem:[%s2926_s16 + $0x60] sm:$0xff] }
 0x69a   : > { %v1630_v4 = vpack.c.bf16 %v1584_v49, %v1582_v34  ;;  %v1631_v41 = vpack.c.bf16 %v1585_v42, %v1583_v58  ;;  %v1629_v47 = vpack.c.bf16 %v1569_v43, %v1567_v31  ;;  %v1624_v13 = vpack.c.bf16 %v1552_v51, %v1550_v60  ;;  %vm2964_vm6 = vmmov %vm2962_vm4  ;;  %v1732_v51 = vld [vmem:[%s2926_s16 + $0xe0] sm:$0xff]  ;;  %v1730_v60 = vld [vmem:[%s2926_s16 + $0xd0] sm:$0xff] }
 0x69b   : > { %v1625_v57 = vpack.c.bf16 %v1553_v48, %v1551_v11  ;;  %v1516_v56 = vsel %vm2960_vm2, %v2675_v59, %v2663_v36  ;;  %v1731_v48 = vld [vmem:[%s2926_s16 + $0xd8] sm:$0xff]  ;;  %v1729_v11 = vld [vmem:[%s2926_s16 + $0xc8] sm:$0xff] }
 0x69c   : > { %1649 = vmatpush.bf16.msra.mxu0 %v1630_v4  ;;  %1677 = vmatpush.bf16.msrb.mxu2 %v1631_v41  ;;  %v1518_v38 = vmul.f32 %v1516_v56, %v2267_v21  ;;  %v1912_v4 = vld [vmem:[%s2923_s13 + $0x8] sm:$0xf0] }
 0x69d   : > { %v1705_v56 = vld [vmem:[%s2926_s16 + $0x8] sm:$0xff] }
 0x69e   : > { %v1603_v32 = vpop.permute.xlu1 %1602  ;;  %v1513_v10 = vpop.permute.xlu0 %1512 }
 0x69f   : > { %v1517_v30 = vsel %vm2958_vm15, %v1513_v10, %v2673_v3  ;;  %v1515_v17 = vsel %vm2959_vm1, %v2673_v3, %v1513_v10  ;;  %v1713_v10 = vld [vmem:[%s2926_s16 + $0x48] sm:$0xff] }
 0x6a0   : > { %1650 = vmatpush.bf16.msra.mxu0 %v1628_v61  ;;  %1678 = vmatpush.bf16.msrb.mxu2 %v1629_v47  ;;  %v1521_v29 = vmul.f32 %v1515_v17, %v2269_v22  ;;  %v1719_v61 = vld [vmem:[%s2926_s16 + $0x78] sm:$0xff]  ;;  %v1734_v47 = vld [vmem:[%s2926_s16 + $0xf0] sm:$0xff]  ;;  %v1708_v17 = vld [vmem:[%s2926_s16 + $0x20] sm:$0xff] }
 0x6a4   : > { %1651 = vmatpush.bf16.msra.mxu0 %v1626_v19  ;;  %1679 = vmatpush.bf16.msrb.mxu2 %v1627_v37  ;;  %v1714_v37 = vld [vmem:[%s2926_s16 + $0x50] sm:$0xff] }
 0x6a6   : > { %v1529_v5 = vpop.permute.xlu1 %1528 }
 0x6a7   : > { %v1531_v1 = vsel %vm768_vm3, %v1525_v18, %v1529_v5  ;;  %v1533_v35 = vsel %vm768_vm3, %v1529_v5, %v1525_v18  ;;  %vm2961_vm3 = vmmov %vm2949_vm0  ;;  %v1520_v18 = vmul.f32 %v1517_v30, %v2267_v21  ;;  %v1728_v5 = vld [vmem:[%s2926_s16 + $0xc0] sm:$0xff]  ;;  %v1727_v30 = vld [vmem:[%s2926_s16 + $0xb8] sm:$0xff] }
 0x6a8   : > { %v1536_v19 = vmul.f32 %v1533_v35, %v2239_v63  ;;  %v1537_v6 = vmul.f32 %v1531_v1, %v2241_v0  ;;  %1652 = vmatpush.bf16.msra.mxu0 %v1624_v13  ;;  %1680 = vmatpush.bf16.msrb.mxu2 %v1625_v57  ;;  %v1514_v55 = vsel %vm2961_vm3, %v2663_v36, %v2675_v59  ;;  %v1607_v59 = vpop.permute.xlu2 %1606  ;;  %vm2965_vm0 = vmmov %vm2962_vm4  ;;  %v1711_v13 = vld [vmem:[%s2926_s16 + $0x38] sm:$0xff]  ;;  %v1710_v1 = vld [vmem:[%s2926_s16 + $0x30] sm:$0xff] }
 0x6a9   : > { %v1501_v63 = vsel %vm2962_vm4, %v1497_v9, %v2691_v20  ;;  %v1500_v0 = vsel %vm2963_vm5, %v1495_v7, %v2689_v16  ;;  %v1498_v36 = vsel %vm2964_vm6, %v2689_v16, %v1495_v7  ;;  %v1519_v33 = vmul.f32 %v1514_v55, %v2269_v22  ;;  %v1605_v16 = vpop.permute.xlu0 %1604  ;;  %v1927_v7 = vld [vmem:[%s2923_s13 + $0x4] sm:$0xf0]  ;;  %v1726_v35 = vld [vmem:[%s2926_s16 + $0xb0] sm:$0xff]  ;;  %v1724_v55 = vld [vmem:[%s2926_s16 + $0xa0] sm:$0xff] }
 0x6aa   : > { %v1622_v25 = vpack.c.bf16 %v1536_v19, %v1534_v40  ;;  %v1623_v3 = vpack.c.bf16 %v1537_v6, %v1535_v2  ;;  %v1610_v34 = vsel %vm848_vm13, %v1603_v32, %v1607_v59  ;;  %v1612_v62 = vsel %vm848_vm13, %v1607_v59, %v1603_v32  ;;  %v1712_v40 = vld [vmem:[%s2926_s16 + $0x40] sm:$0xff]  ;;  %v1709_v57 = vld [vmem:[%s2926_s16 + $0x28] sm:$0xff]  ;;  %v1707_v19 = vld [vmem:[%s2926_s16 + $0x18] sm:$0xff] }
 0x6ab   : > { %v1499_v26 = vsel %vm2965_vm0, %v2691_v20, %v1497_v9  ;;  %v1504_v21 = vmul.f32 %v1501_v63, %v2272_v23  ;;  %v1502_v39 = vmul.f32 %v1500_v0, %v2272_v23  ;;  %v1620_v52 = vpack.c.bf16 %v1520_v18, %v1518_v38  ;;  %v1910_v20 = vld [vmem:[%s2923_s13] sm:$0xf]  ;;  %v1715_v9 = vld [vmem:[%s2926_s16 + $0x58] sm:$0xff]  ;;  %v1725_v2 = vld [vmem:[%s2926_s16 + $0xa8] sm:$0xff] }
 0x6ac   : > { %1653 = vmatpush.bf16.msra.mxu0 %v1622_v25  ;;  %1681 = vmatpush.bf16.msrb.mxu2 %v1623_v3  ;;  %v1503_v22 = vmul.f32 %v1498_v36, %v2274_v24  ;;  %v1621_v42 = vpack.c.bf16 %v1521_v29, %v1519_v33  ;;  %v1614_v45 = vmul.f32 %v1610_v34, %v2173_v14  ;;  %v1706_v6 = vld [vmem:[%s2926_s16 + $0x10] sm:$0xff]  ;;  %v1704_v18 = vld [vmem:[%s2926_s16] sm:$0xff]  ;;  %v1723_v25 = vld [vmem:[%s2926_s16 + $0x98] sm:$0xff] }
 0x6ad   : > { %v1615_v23 = vmul.f32 %v1612_v62, %v2175_v15  ;;  %v1505_v41 = vmul.f32 %v1499_v26, %v2274_v24  ;;  %v1618_v28 = vpack.c.bf16 %v1504_v21, %v1502_v39  ;;  %v1911_v31 = vor.u32 %v1927_v7, %v1910_v20  ;;  %v1718_v24 = vld [vmem:[%s2926_s16 + $0x70] sm:$0xff]  ;;  %v1721_v63 = vld [vmem:[%s2926_s16 + $0x88] sm:$0xff]  ;;  %v1720_v0 = vld [vmem:[%s2926_s16 + $0x80] sm:$0xff] }
 0x6ae   : > { %v1609_v58 = vpop.permute.xlu1 %1608  ;;  %v1915_v32 = vor.u32 %v1926_v12, %v1912_v4  ;;  %v1722_v3 = vld [vmem:[%s2926_s16 + $0x90] sm:$0xff] }
 0x6af   : > { %v1611_v27 = vsel %vm848_vm13, %v1605_v16, %v1609_v58  ;;  %v1613_v49 = vsel %vm848_vm13, %v1609_v58, %v1605_v16  ;;  %vm1794_vm13 = vcmask 523264  }
 0x6b0   : > { %v1616_v53 = vmul.f32 %v1611_v27, %v2173_v14  ;;  %v1617_v54 = vmul.f32 %v1613_v49, %v2175_v15  ;;  %1654 = vmatpush.bf16.msra.mxu0 %v1620_v52  ;;  %1682 = vmatpush.bf16.msrb.mxu2 %v1621_v42  ;;  %v1619_v15 = vpack.c.bf16 %v1505_v41, %v1503_v22 }
 0x6b1   : > { %v1741_v22 = vpop.permute.xlu0 %1740 }
 0x6b2   : > { %v1634_v43 = vpack.c.bf16 %v1616_v53, %v1614_v45  ;;  %v1635_v14 = vpack.c.bf16 %v1617_v54, %v1615_v23  ;;  %v1746_v45 = vpop.permute.xlu2 %1745 }
 0x6b4   : > { %1655 = vmatpush.bf16.msra.mxu0 %v1618_v28  ;;  %1669 = vmatpush.bf16.msrb.mxu1 %v1634_v43 }
 0x6b5   : > { %1683 = vmatpush.bf16.msrb.mxu2 %v1619_v15  ;;  %1697 = vmatpush.bf16.msra.mxu3 %v1635_v14 }
 0x6b7   : > { %1656 = vmatmul.bf16.vlgmr.msra.gmra.mxu0 %v1911_v31  ;;  %1916 = vmatmul.msk.bf16.vlgmr.msrb.gmra.mxu1 %vm930_vm8, %v1915_v32 }
 0x6b8   : > { %1748 = vmatpush.msra.mxu1 %v1719_v61  ;;  %1684 = vmatmul.bf16.vlgmr.msrb.gmra.mxu2 %v1911_v31 }
 0x6b9   : > { %1771 = vmatpush.msrb.mxu3 %v1735_v8 }
 0x6ba   : > { %1917 = vmatmul.msk.bf16.vlgmr.msra.gmra.mxu3 %vm930_vm8, %v1915_v32  ;;  %1749 = vmatpush.msra.mxu1 %v1718_v24 }
 0x6bb   : > { %1772 = vmatpush.msrb.mxu3 %v1734_v47 }
 0x6bc   : > { %1750 = vmatpush.msra.mxu1 %v1717_v44 }
 0x6bd   : > { %1773 = vmatpush.msrb.mxu3 %v1733_v46 }
 0x6be   : > { %1751 = vmatpush.msra.mxu1 %v1716_v50 }
 0x6bf   : > { %1774 = vmatpush.msrb.mxu3 %v1732_v51 }
 0x6c0   : > { %1752 = vmatpush.msra.mxu1 %v1715_v9 }
 0x6c1   : > { %1775 = vmatpush.msrb.mxu3 %v1731_v48 }
 0x6c2   : > { %1753 = vmatpush.msra.mxu1 %v1714_v37 }
 0x6c3   : > { %1776 = vmatpush.msrb.mxu3 %v1730_v60 }
 0x6c4   : > { %1754 = vmatpush.msra.mxu1 %v1713_v10 }
 0x6c5   : > { %1777 = vmatpush.msrb.mxu3 %v1729_v11 }
 0x6c6   : > { %1755 = vmatpush.msra.mxu1 %v1712_v40 }
 0x6c7   : > { %1778 = vmatpush.msrb.mxu3 %v1728_v5 }
 0x6c8   : > { %1756 = vmatpush.msra.mxu1 %v1711_v13 }
 0x6c9   : > { %1779 = vmatpush.msrb.mxu3 %v1727_v30 }
 0x6ca   : > { %1757 = vmatpush.msra.mxu1 %v1710_v1 }
 0x6cb   : > { %1780 = vmatpush.msrb.mxu3 %v1726_v35 }
 0x6cc   : > { %1758 = vmatpush.msra.mxu1 %v1709_v57 }
 0x6cd   : > { %1781 = vmatpush.msrb.mxu3 %v1725_v2 }
 0x6ce   : > { %1759 = vmatpush.msra.mxu1 %v1708_v17 }
 0x6cf   : > { %1782 = vmatpush.msrb.mxu3 %v1724_v55 }
 0x6d0   : > { %1760 = vmatpush.msra.mxu1 %v1707_v19 }
 0x6d1   : > { %1783 = vmatpush.msrb.mxu3 %v1723_v25 }
 0x6d2   : > { %1761 = vmatpush.msra.mxu1 %v1706_v6 }
 0x6d3   : > { %1784 = vmatpush.msrb.mxu3 %v1722_v3 }
 0x6d4   : > { %1762 = vmatpush.msra.mxu1 %v1705_v56 }
 0x6d5   : > { %1785 = vmatpush.msrb.mxu3 %v1721_v63 }
 0x6d6   : > { %1763 = vmatpush.msra.mxu1 %v1704_v18 }
 0x6d7   : > { %1786 = vmatpush.msrb.mxu3 %v1720_v0 }
 0x734   : > { %v1657_v29 = vpop.f32.mrf.mxu0  ;;  %v1671_v38 = vpop.f32.mrf.mxu1 }
 0x735   : > { %v1672_v36 = vadd.f32 %v1671_v38, %v1657_v29 }
 0x737   : > { %1764 = vmatmul.f32.vlgmr.msra.gmra.mxu1 %v1672_v36 }
 0x73b   : > { %v1685_v59 = vpop.f32.mrf.mxu2 }
 0x73c   : > { %v1659_v62 = vpop.f32.mrf.mxu0  ;;  %v1673_v26 = vpop.f32.mrf.mxu1 }
 0x73d   : > { %v1699_v33 = vpop.f32.mrf.mxu3  ;;  %v1674_v21 = vadd.f32 %v1673_v26, %v1659_v62 }
 0x73e   : > { %v1700_v34 = vadd.f32 %v1699_v33, %v1685_v59 }
 0x73f   : > { %1767 = vmatmul.f32.gmra.mxu1 %v1674_v21 }
 0x740   : > { %1787 = vmatmul.f32.vlgmr.msrb.gmra.mxu3 %v1700_v34 }
 0x743   : > { %v1687_v39 = vpop.f32.mrf.mxu2 }
 0x745   : > { %v1701_v16 = vpop.f32.mrf.mxu3 }
 0x746   : > { %v1702_v58 = vadd.f32 %v1701_v16, %v1687_v39 }
 0x748   : > { %1790 = vmatmul.f32.gmra.mxu3 %v1702_v58 }
 0x7b4   : > { %v1765_v52 = vpop.f32.mrf.mxu1 }
 0x7b5   : > { %v1766_v27 = vadd.f32 %v1765_v52, %v1741_v22 }
 0x7bc   : > { %v1768_v20 = vpop.f32.mrf.mxu1 }
 0x7bd   : > { %v1769_v23 = vadd.f32 %v1768_v20, %v1746_v45 }
 0x7c3   : > { %v1788_v49 = vpop.f32.mrf.mxu3 }
 0x7c4   : > { %v1789_v42 = vadd.f32 %v1788_v49, %v1766_v27 }
 0x7c6   : > { %1795 = vst.msk [vmem:[%s548_s29] sm:$0xff] %vm1794_vm13, %v1789_v42 }
 0x7cb   : > { %v1791_v53 = vpop.f32.mrf.mxu3 }
 0x7cc   : > { %v1792_v54 = vadd.f32 %v1791_v53, %v1769_v23 }
 0x7ce   : > { %1796 = vst.msk [vmem:[%s548_s29 + $0x8] sm:$0xff] %vm1794_vm13, %v1792_v54 }
 0x7cf PF: > { %s27_s24 = sadd.s32 1, %s1992_s24  }
 0x7d0   : > { %p24_p4 = scmp.ge.s32.totalorder %s27_s24, 4  }
 0x7d2   :  { %26 = sbr.rel (!%p24_p4) target bundleno = 3 (0x3), region = 125 }

</bundles_post_ra>
